<compile_context>
chip_gen: v7x
topology: tpu7x:2x2x1
jax: 0.10.0
libtpu: 0.0.40
codegen_flags: <defaults>
</compile_context>

<pallas_src>
import functools

import jax
import jax.numpy as jnp
from jax.experimental import pallas as pl
from jax.experimental.pallas import tpu as pltpu


_K_PAD = 128   # padded conv-stem contraction dim (C*9 -> 128)
_C_PAD = 128   # padded conv-stem output channels (stem_ch -> 128)

_PARALLEL_1D = pltpu.CompilerParams(dimension_semantics=("parallel",))
_ARBITRARY_1D = pltpu.CompilerParams(dimension_semantics=("arbitrary",))


# ----------------------------- Pallas kernels -----------------------------

def _backbone_kernel(p_ref, cw_ref, fw_ref, o_ref, *, hw, imgs_per_block):
    """conv-stem matmul (im2col rows, lane-padded) + ReLU + GAP + fc, fused."""
    p = p_ref[...]                                                    # (n*HW, Kpad) bf16
    h = jnp.dot(p, cw_ref[...], preferred_element_type=jnp.float32)  # (n*HW, Cpad) f32
    h = jnp.maximum(h, 0.0)
    # one reshape + one sublane reduction instead of per-image slice/concat
    pooled = jnp.mean(h.reshape(imgs_per_block, hw, h.shape[-1]), axis=1)  # (n, Cpad)
    o_ref[...] = jnp.dot(pooled.astype(jnp.bfloat16), fw_ref[...],
                         preferred_element_type=jnp.float32)          # (n, repr)


def _grouped_mlp_kernel(x_ref, w1_ref, g_ref, b_ref, w2_ref, o_ref, *, eps):
    """load_mlp(in,'A-B'): Linear -> BN (per-group batch stats) -> ReLU -> Linear.

    All G groups of this call-site are processed by ONE matmul over (G*B, in);
    BatchNorm statistics are taken per group via a (G, B, hid) reshape, which is
    exactly PyTorch's training-mode behaviour for G separate module calls.
    """
    g, bn, in_dim = x_ref.shape
    x = x_ref[...].reshape(g * bn, in_dim)
    h = jnp.dot(x.astype(jnp.bfloat16), w1_ref[...],
                preferred_element_type=jnp.float32)                   # (G*B, hid)
    hid = h.shape[-1]
    hg = h.reshape(g, bn, hid)
    mean = jnp.mean(hg, axis=1, keepdims=True)                        # (G, 1, hid)
    var = jnp.mean(jnp.square(hg - mean), axis=1, keepdims=True)      # biased var
    hn = (hg - mean) * jax.lax.rsqrt(var + eps)
    hn = hn * g_ref[...] + b_ref[...]                                 # (1,hid) broadcast
    hn = jnp.maximum(hn, 0.0).reshape(g * bn, hid)
    out = jnp.dot(hn.astype(jnp.bfloat16), w2_ref[...],
                  preferred_element_type=jnp.float32)                 # (G*B, out)
    o_ref[...] = out.reshape(g, bn, out.shape[-1])


def _equitrans_kernel(r_ref, t_ref, w_ref, o_ref, *, d, td, kc):
    """EquiTrans forward, hypernet matmul fused with the per-sample matvec.

    PyTorch computes   out[b, j] = sum_i r[b, i] * (t @ hyper_wt)[b, j*D + i].
    With w_rhs[i, k*D + j] = hyper_wt[k, j*D + i] (precomputed at init):
        g[b, k*D + j] = sum_i r[b, i] * w_rhs[i, k*D + j]   (MXU matmul)
        out[b, j]     = sum_k t[b, k] * g[b, k*D + j]       (cheap FMAs)
    The matmul is chunked over k (kc columns of D at a time) so the live f32
    intermediate stays at (rows, kc*D) instead of (rows, Td*D) — no register
    spills, and the (B, D*D) hypernet output never touches HBM.
    """
    r = r_ref[...].astype(jnp.bfloat16)                               # (rows, D)
    t = t_ref[...]                                                    # (rows, Td) f32
    acc = jnp.zeros((r.shape[0], d), jnp.float32)
    for k0 in range(0, td, kc):
        g = jnp.dot(r, w_ref[:, k0 * d:(k0 + kc) * d],
                    preferred_element_type=jnp.float32)               # (rows, kc*D)
        for k in range(kc):
            acc = acc + t[:, k0 + k:k0 + k + 1] * g[:, k * d:(k + 1) * d]
    o_ref[...] = acc


def _info_nce_kernel(z1_ref, z2_ref, o_ref, *, inv_temp):
    """NT-Xent / InfoNCE for one (z1, z2) pair (positives stay in the denominator,
    only the diagonal is masked, matching F.cross_entropy on the masked scores)."""
    z1 = z1_ref[...]                                                  # (n, P) f32
    z2 = z2_ref[...]
    # F.normalize(z, dim=1): z / max(||z||, 1e-12) == z * rsqrt(max(||z||^2, 1e-24))
    z1n = z1 * jax.lax.rsqrt(jnp.maximum(jnp.sum(z1 * z1, axis=1, keepdims=True), 1e-24))
    z2n = z2 * jax.lax.rsqrt(jnp.maximum(jnp.sum(z2 * z2, axis=1, keepdims=True), 1e-24))
    z = jnp.concatenate([z1n, z2n], axis=0)                           # (2n, P)
    scores = jax.lax.dot_general(
        z, z, (((1,), (1,)), ((), ())), preferred_element_type=jnp.float32) * inv_temp
    m = z.shape[0]
    rows = jax.lax.broadcasted_iota(jnp.int32, (m, m), 0)
    cols = jax.lax.broadcasted_iota(jnp.int32, (m, m), 1)
    scores = jnp.where(rows == cols, jnp.float32(-1e30), scores)      # diag -> -inf
    # label of row i is (i+n) mod 2n  =>  positive logit is <z1n_i, z2n_i>/T
    pos = jnp.sum(z1n * z2n, axis=1, keepdims=True) * inv_temp        # (n, 1)
    pos = jnp.concatenate([pos, pos], axis=0)                         # (2n, 1)
    row_max = jnp.max(scores, axis=1, keepdims=True)
    lse = jnp.log(jnp.sum(jnp.exp(scores - row_max), axis=1, keepdims=True)) + row_max
    o_ref[...] = jnp.mean(lse - pos, keepdims=True)                   # (1, 1)


# ----------------------------- Pallas wrappers -----------------------------

def pl_backbone(patches, conv_wt, fc_wt, *, n_imgs, hw):
    rows, kdim = patches.shape
    cout = conv_wt.shape[1]
    rd = fc_wt.shape[1]
    half = n_imgs // 2
    ipb = half if (half > 0 and half % 8 == 0) else n_imgs            # images per grid step
    grid = (n_imgs // ipb,)
    rpb = ipb * hw
    return pl.pallas_call(
        functools.partial(_backbone_kernel, hw=hw, imgs_per_block=ipb),
        grid=grid,
        in_specs=[pl.BlockSpec((rpb, kdim), lambda i: (i, 0)),
                  pl.BlockSpec((kdim, cout), lambda i: (0, 0)),
                  pl.BlockSpec((cout, rd), lambda i: (0, 0))],
        out_specs=pl.BlockSpec((ipb, rd), lambda i: (i, 0)),
        out_shape=jax.ShapeDtypeStruct((n_imgs, rd), jnp.float32),
        compiler_params=_PARALLEL_1D,
    )(patches, conv_wt, fc_wt)


def pl_mlp_groups(x, params, eps=1e-5):
    """x: (G, B, in) — all G call-sites of ONE MLP in a single grid step."""
    w1, gamma, beta, w2 = params["w1"], params["gamma"], params["beta"], params["w2"]
    g, bn, in_dim = x.shape
    hid = w1.shape[-1]
    out = w2.shape[-1]
    return pl.pallas_call(
        functools.partial(_grouped_mlp_kernel, eps=eps),
        grid=(1,),
        in_specs=[pl.BlockSpec((g, bn, in_dim), lambda i: (0, 0, 0)),
                  pl.BlockSpec((in_dim, hid), lambda i: (0, 0)),
                  pl.BlockSpec((1, hid), lambda i: (0, 0)),
                  pl.BlockSpec((1, hid), lambda i: (0, 0)),
                  pl.BlockSpec((hid, out), lambda i: (0, 0))],
        out_specs=pl.BlockSpec((g, bn, out), lambda i: (0, 0, 0)),
        out_shape=jax.ShapeDtypeStruct((g, bn, out), jnp.float32),
        compiler_params=_ARBITRARY_1D,
    )(x, w1, gamma, beta, w2)


def pl_mlp_two_heads(x, params, eps=1e-5):
    """x: (H, G, B, in).  One grid step per head (weights selected by head index);
    each head's G groups collapse into a single matmul with per-group BN stats.
    The 2-step grid is marked 'parallel' so v7x's two TensorCores both work."""
    w1, gamma, beta, w2 = params["w1"], params["gamma"], params["beta"], params["w2"]
    nh, g, bn, in_dim = x.shape
    hid = w1.shape[-1]
    out = w2.shape[-1]
    return pl.pallas_call(
        functools.partial(_grouped_mlp_kernel, eps=eps),
        grid=(nh,),
        in_specs=[pl.BlockSpec((None, g, bn, in_dim), lambda i: (i, 0, 0, 0)),
                  pl.BlockSpec((None, in_dim, hid), lambda i: (i, 0, 0)),
                  pl.BlockSpec((None, 1, hid), lambda i: (i, 0, 0)),
                  pl.BlockSpec((None, 1, hid), lambda i: (i, 0, 0)),
                  pl.BlockSpec((None, hid, out), lambda i: (i, 0, 0))],
        out_specs=pl.BlockSpec((None, g, bn, out), lambda i: (i, 0, 0, 0)),
        out_shape=jax.ShapeDtypeStruct((nh, g, bn, out), jnp.float32),
        compiler_params=_PARALLEL_1D,
    )(x, w1, gamma, beta, w2)


def pl_equitrans(r_all, t_all, w_rhs, *, d, td):
    n = r_all.shape[0]
    kc = 8 if td % 8 == 0 else (4 if td % 4 == 0 else 1)
    # TODO(synk): on v7x split the row axis into a 2-step 'parallel' grid.
    return pl.pallas_call(
        functools.partial(_equitrans_kernel, d=d, td=td, kc=kc),
        grid=(1,),
        in_specs=[pl.BlockSpec((n, d), lambda i: (0, 0)),
                  pl.BlockSpec((n, td), lambda i: (0, 0)),
                  pl.BlockSpec((d, td * d), lambda i: (0, 0))],
        out_specs=pl.BlockSpec((n, d), lambda i: (0, 0)),
        out_shape=jax.ShapeDtypeStruct((n, d), jnp.float32),
        compiler_params=_ARBITRARY_1D,
    )(r_all, t_all, w_rhs)


def pl_info_nce_grouped(z1, z2, temperature):
    """z1, z2: (G, n, P); returns (G,) losses (each group is one independent loss)."""
    g, n, p = z1.shape
    out = pl.pallas_call(
        functools.partial(_info_nce_kernel, inv_temp=1.0 / float(temperature)),
        grid=(g,),
        in_specs=[pl.BlockSpec((None, n, p), lambda i: (i, 0, 0)),
                  pl.BlockSpec((None, n, p), lambda i: (i, 0, 0))],
        out_specs=pl.BlockSpec((None, 1, 1), lambda i: (i, 0, 0)),
        out_shape=jax.ShapeDtypeStruct((g, 1, 1), jnp.float32),
        compiler_params=_PARALLEL_1D,
    )(z1, z2)
    return out[:, 0, 0]


# ----------------------------- model (glue) -----------------------------

def backbone_forward(x, bb):
    """Simplified backbone: conv3x3(pad=1)+ReLU -> global avg pool -> linear.

    Runs ONCE on the concatenated [x1; x2] batch (the stand-in has no BN so this
    is exact).  The im2col patches are lane-padded to the 128-wide contraction
    the conv weights were padded to at init.
    """
    b, c, h, w = x.shape
    xp = jnp.pad(x, ((0, 0), (0, 0), (1, 1), (1, 1)))
    patches = jnp.stack(
        [xp[:, :, i:i + h, j:j + w] for i in range(3) for j in range(3)], axis=2
    )                                                     # (B, C, 9, H, W)
    patches = jnp.transpose(patches, (0, 3, 4, 1, 2)).reshape(b * h * w, c * 9)
    kdim = bb["conv_wt"].shape[0]                         # padded contraction (128)
    patches = jnp.pad(patches, ((0, 0), (0, kdim - c * 9))).astype(jnp.bfloat16)
    return pl_backbone(patches, bb["conv_wt"], bb["fc_wt"], n_imgs=b, hw=h * w)


def stl_forward(params, cfg, x1, x2):
    b = x1.shape[0]
    assert b % 2 == 0, "STL index bookkeeping requires an even batch size"

    # --- backbone (one fused call for both views) ---
    x_both = jnp.concatenate([x1, x2], axis=0)                        # (2B, C, H, W)
    y_both = backbone_forward(x_both, params["backbone"])             # (2B, R)
    y1, y2 = y_both[:b], y_both[b:]

    # --- trans backbone: both calls as 2 groups in ONE fused matmul launch ---
    tb_in = jnp.stack([jnp.concatenate([y1, y2], axis=-1),
                       jnp.concatenate([y2, y1], axis=-1)], axis=0)   # (2, B, 2R)
    yt = pl_mlp_groups(tb_in, params["trans_backbone"])               # (2, B, Td)
    y_trans122, y_trans221 = yt[0], yt[1]
    td = y_trans122.shape[-1]

    # --- static even/odd selection and pair-swap (no dynamic gathers) ---
    p122 = y_trans122.reshape(b // 2, 2, td)
    p221 = y_trans221.reshape(b // 2, 2, td)
    y_trans1 = jnp.concatenate([p122[:, 0], p221[:, 0]], axis=0)      # even rows
    y_trans2 = jnp.concatenate([p122[:, 1], p221[:, 1]], axis=0)      # odd rows
    shifted122 = p122[:, ::-1, :].reshape(b, td)                      # [1,0,3,2,...]
    shifted221 = p221[:, ::-1, :].reshape(b, td)

    # --- EquiTrans (both calls batched; no BN so batching is exact) ---
    d = y1.shape[-1]
    r_all = jnp.concatenate([y2, y1], axis=0)                         # (2B, R)
    t_all = jnp.concatenate([shifted221, shifted122], axis=0)         # (2B, Td)
    y_pred = pl_equitrans(r_all, t_all, params["equitrans_w_rhs"], d=d, td=td)
    y_pred1, y_pred2 = y_pred[:b], y_pred[b:]

    # --- inv + equi projectors merged into one 2-head launch ---
    # head 0 = inv_projector  (groups 2,3 are dummies, outputs discarded)
    # head 1 = equi_projector (groups y1, y2, y_pred1, y_pred2)
    proj_x = jnp.stack([
        jnp.stack([y1, y2, y1, y2], axis=0),
        jnp.stack([y1, y2, y_pred1, y_pred2], axis=0),
    ], axis=0)                                                        # (2, 4, B, R)
    z_heads = pl_mlp_two_heads(proj_x, params["proj_heads"])          # (2, 4, B, P)
    z_inv = z_heads[0, :2]                                            # (2, B, P)
    z_eq = z_heads[1]                                                 # (4, B, P)

    # --- trans projector (2 groups, one launch) ---
    z_tr = pl_mlp_groups(jnp.stack([y_trans1, y_trans2], axis=0),
                         params["trans_projector"])                   # (2, B, Pt)

    # --- InfoNCE losses ---
    temperature = cfg["temperature"]
    if z_inv.shape[1:] == z_tr.shape[1:]:
        # inv + trans losses share one grouped call (same n, P)
        l2 = pl_info_nce_grouped(jnp.stack([z_inv[0], z_tr[0]], axis=0),
                                 jnp.stack([z_inv[1], z_tr[1]], axis=0),
                                 temperature)
        inv_loss, trans_loss = l2[0], l2[1]
    else:
        inv_loss = pl_info_nce_grouped(z_inv[0][None], z_inv[1][None], temperature)[0]
        trans_loss = pl_info_nce_grouped(z_tr[0][None], z_tr[1][None], temperature)[0]

    z_equi = jnp.concatenate([z_eq[0], z_eq[1]], axis=0)              # (2B, P)
    z_equi_pred = jnp.concatenate([z_eq[2], z_eq[3]], axis=0)         # (2B, P)
    equi_loss = pl_info_nce_grouped(z_equi[None], z_equi_pred[None], temperature)[0]

    total = (cfg["inv"] * inv_loss + cfg["equi"] * equi_loss
             + cfg["trans"] * trans_loss)
    return total, inv_loss, equi_loss, trans_loss


# ----------------------------- param init -----------------------------

def _dense(key, out_dim, in_dim, dtype=jnp.float32):
    # deterministic stand-in for nn.Linear(bias=False) weight; stored pre-transposed
    w = (jax.random.normal(key, (in_dim, out_dim), jnp.float32)
         / jnp.sqrt(jnp.float32(in_dim)))
    return w.astype(dtype)


def _mlp_params(key, in_dim, layers_str):
    sizes = [in_dim] + [int(s) for s in layers_str.split("-")]
    assert len(sizes) == 3, "this script instantiates the 2-layer load_mlp case"
    k1, k2 = jax.random.split(key)
    return {
        "w1": _dense(k1, sizes[1], sizes[0], jnp.bfloat16),   # (in, hidden) bf16
        "gamma": jnp.ones((1, sizes[1]), jnp.float32),        # BatchNorm1d weight
        "beta": jnp.zeros((1, sizes[1]), jnp.float32),        # BatchNorm1d bias
        "w2": _dense(k2, sizes[2], sizes[1], jnp.bfloat16),   # (hidden, out) bf16
    }


def init_params(key, *, in_ch, stem_ch, repr_dim, trans_backbone, projector,
                trans_projector):
    ks = jax.random.split(key, 8)
    trans_repr_dim = int(trans_backbone.split("-")[-1])
    assert in_ch * 9 <= _K_PAD and stem_ch <= _C_PAD

    # conv-stem + fc weights, zero-padded to lane-dense (128) shapes (exact).
    conv_w = (jax.random.normal(ks[0], (stem_ch, in_ch, 3, 3), jnp.float32)
              / jnp.sqrt(jnp.float32(in_ch * 9)))
    conv_wt = jnp.zeros((_K_PAD, _C_PAD), jnp.float32)
    conv_wt = conv_wt.at[:in_ch * 9, :stem_ch].set(conv_w.reshape(stem_ch, in_ch * 9).T)
    fc_w = _dense(ks[1], repr_dim, stem_ch, jnp.float32)      # (stem_ch, repr)
    fc_wt = jnp.zeros((_C_PAD, repr_dim), jnp.float32).at[:stem_ch].set(fc_w)
    backbone = {"conv_wt": conv_wt.astype(jnp.bfloat16),
                "fc_wt": fc_wt.astype(jnp.bfloat16)}

    # Hypernet weight, stored as the PyTorch-equivalent (Td, D*D) (= W_pt.T), then
    # re-laid-out once so the fused EquiTrans kernel only needs MXU matmuls:
    #   w_rhs[i, k*D + j] = hyper_wt[k, j*D + i]
    hyper_wt = _dense(ks[3], repr_dim * repr_dim, trans_repr_dim, jnp.float32)
    w_rhs = (hyper_wt.reshape(trans_repr_dim, repr_dim, repr_dim)
             .transpose(2, 0, 1)
             .reshape(repr_dim, trans_repr_dim * repr_dim))

    # inv and equi projectors always share (in, hid, out); stack for one launch.
    inv_p = _mlp_params(ks[4], repr_dim, projector)
    equi_p = _mlp_params(ks[5], repr_dim, projector)
    proj_heads = {k: jnp.stack([inv_p[k], equi_p[k]], axis=0) for k in inv_p}

    return {
        "backbone": backbone,
        "trans_backbone": _mlp_params(ks[2], 2 * repr_dim, trans_backbone),
        "equitrans_w_rhs": w_rhs.astype(jnp.bfloat16),
        "equitrans_hyper_wt_ref": hyper_wt,   # f32, only for the re-layout spot-check
        "proj_heads": proj_heads,
        "trans_projector": _mlp_params(ks[6], trans_repr_dim, trans_projector),
    }


# ----------------------------- main -----------------------------

if __name__ == "__main__":
    # small, even batch (the model's index bookkeeping requires batch_size % 2 == 0)
    B, C, H, W = 8, 4, 16, 16
    repr_dim = 128      # lane-dense backbone / EquiTrans outputs (real ResNet18: 512)
    trans_repr_dim = 32
    cfg = {"inv": 1.0, "equi": 0.5, "trans": 0.5, "temperature": 0.5}

    key = jax.random.PRNGKey(0)
    kx1, kx2, kp = jax.random.split(key, 3)
    x1 = jax.random.normal(kx1, (B, C, H, W), jnp.float32)
    x2 = jax.random.normal(kx2, (B, C, H, W), jnp.float32)

    params = init_params(
        kp, in_ch=C, stem_ch=16, repr_dim=repr_dim,
        trans_backbone="64-32", projector="64-32", trans_projector="32-32",
    )

    # --- spot-check: EquiTrans w_rhs re-layout vs the PyTorch bmm index order ---
    kr, kt = jax.random.split(jax.random.PRNGKey(1))
    r_chk = jax.random.normal(kr, (2 * B, repr_dim), jnp.float32)
    t_chk = jax.random.normal(kt, (2 * B, trans_repr_dim), jnp.float32)
    out_pl = pl_equitrans(r_chk, t_chk, params["equitrans_w_rhs"],
                          d=repr_dim, td=trans_repr_dim)
    all_w = t_chk @ params["equitrans_hyper_wt_ref"]            # (B, D*D) f32
    w_resh = all_w.reshape(-1, repr_dim, repr_dim)               # [b, j, i]
    out_ref = jnp.einsum("bi,bji->bj", r_chk, w_resh)
    rel_err = float(jnp.linalg.norm(out_pl - out_ref) / jnp.linalg.norm(out_ref))
    assert rel_err < 5e-2, f"EquiTrans re-layout mismatch: rel err {rel_err}"

    fwd = jax.jit(functools.partial(stl_forward, params, cfg))
    total, inv_l, equi_l, trans_l = fwd(x1, x2)
    jax.block_until_ready((total, inv_l, equi_l, trans_l))

    assert total.shape == () and bool(jnp.isfinite(total))
    print("KERNEL_OK")
</pallas_src>

<mosaic_0001>
module attributes {stable_mosaic.version = 11 : i64} {
  func.func @_equitrans_kernel(%arg0: i32, %arg1: memref<16x128xf32, #tpu.memory_space<vmem>>, %arg2: memref<16x32xf32, #tpu.memory_space<vmem>>, %arg3: memref<128x4096xbf16, #tpu.memory_space<vmem>>, %arg4: memref<16x128xf32, #tpu.memory_space<vmem>>) attributes {dimension_semantics = [#tpu.dimension_semantics<arbitrary>], iteration_bounds = array<i64: 1>, scalar_prefetch = 0 : i64, scratch_operands = 0 : i64, tpu.core_type = #tpu.core_type<tc>, window_params = [{pipeline_mode = #tpu.pipeline_mode<synchronous>, transform_indices = @transform_0, window_bounds = array<i64: 16, 128>}, {pipeline_mode = #tpu.pipeline_mode<synchronous>, transform_indices = @transform_1, window_bounds = array<i64: 16, 32>}, {pipeline_mode = #tpu.pipeline_mode<synchronous>, transform_indices = @transform_2, window_bounds = array<i64: 128, 4096>}, {pipeline_mode = #tpu.pipeline_mode<synchronous>, transform_indices = @transform_3, window_bounds = array<i64: 16, 128>}]} {
    %c0 = arith.constant 0 : index
    %c0_0 = arith.constant 0 : index
    %0 = vector.load %arg1[%c0, %c0_0] : memref<16x128xf32, #tpu.memory_space<vmem>>, vector<16x128xf32>
    %1 = arith.truncf %0 : vector<16x128xf32> to vector<16x128xbf16>
    %c0_1 = arith.constant 0 : index
    %c0_2 = arith.constant 0 : index
    %2 = vector.load %arg2[%c0_1, %c0_2] : memref<16x32xf32, #tpu.memory_space<vmem>>, vector<16x32xf32>
    %cst = arith.constant 0.000000e+00 : f32
    %3 = vector.broadcast %cst : f32 to vector<16x128xf32>
    %c0_3 = arith.constant 0 : index
    %c0_4 = arith.constant 0 : index
    %4 = vector.load %arg3[%c0_3, %c0_4] : memref<128x4096xbf16, #tpu.memory_space<vmem>>, vector<128x1024xbf16>
    %cst_5 = arith.constant dense<0.000000e+00> : vector<16x1024xf32>
    %5 = tpu.matmul %1, %4, %cst_5 {dimension_numbers = #tpu.dot_dimension_numbers<[1], [0], [0], [1], [0, 0, 1, 1], [], []>} : vector<16x128xbf16>, vector<128x1024xbf16>, vector<16x1024xf32> -> vector<16x1024xf32>
    %6 = vector.extract_strided_slice %2 {offsets = [0, 0], sizes = [16, 1], strides = [1, 1]} : vector<16x32xf32> to vector<16x1xf32>
    %7 = vector.extract_strided_slice %5 {offsets = [0, 0], sizes = [16, 128], strides = [1, 1]} : vector<16x1024xf32> to vector<16x128xf32>
    %8 = vector.broadcast %6 : vector<16x1xf32> to vector<16x128xf32>
    %9 = arith.mulf %8, %7 : vector<16x128xf32>
    %10 = arith.addf %3, %9 : vector<16x128xf32>
    %11 = vector.extract_strided_slice %2 {offsets = [0, 1], sizes = [16, 1], strides = [1, 1]} : vector<16x32xf32> to vector<16x1xf32>
    %12 = vector.extract_strided_slice %5 {offsets = [0, 128], sizes = [16, 128], strides = [1, 1]} : vector<16x1024xf32> to vector<16x128xf32>
    %13 = vector.broadcast %11 : vector<16x1xf32> to vector<16x128xf32>
    %14 = arith.mulf %13, %12 : vector<16x128xf32>
    %15 = arith.addf %10, %14 : vector<16x128xf32>
    %16 = vector.extract_strided_slice %2 {offsets = [0, 2], sizes = [16, 1], strides = [1, 1]} : vector<16x32xf32> to vector<16x1xf32>
    %17 = vector.extract_strided_slice %5 {offsets = [0, 256], sizes = [16, 128], strides = [1, 1]} : vector<16x1024xf32> to vector<16x128xf32>
    %18 = vector.broadcast %16 : vector<16x1xf32> to vector<16x128xf32>
    %19 = arith.mulf %18, %17 : vector<16x128xf32>
    %20 = arith.addf %15, %19 : vector<16x128xf32>
    %21 = vector.extract_strided_slice %2 {offsets = [0, 3], sizes = [16, 1], strides = [1, 1]} : vector<16x32xf32> to vector<16x1xf32>
    %22 = vector.extract_strided_slice %5 {offsets = [0, 384], sizes = [16, 128], strides = [1, 1]} : vector<16x1024xf32> to vector<16x128xf32>
    %23 = vector.broadcast %21 : vector<16x1xf32> to vector<16x128xf32>
    %24 = arith.mulf %23, %22 : vector<16x128xf32>
    %25 = arith.addf %20, %24 : vector<16x128xf32>
    %26 = vector.extract_strided_slice %2 {offsets = [0, 4], sizes = [16, 1], strides = [1, 1]} : vector<16x32xf32> to vector<16x1xf32>
    %27 = vector.extract_strided_slice %5 {offsets = [0, 512], sizes = [16, 128], strides = [1, 1]} : vector<16x1024xf32> to vector<16x128xf32>
    %28 = vector.broadcast %26 : vector<16x1xf32> to vector<16x128xf32>
    %29 = arith.mulf %28, %27 : vector<16x128xf32>
    %30 = arith.addf %25, %29 : vector<16x128xf32>
    %31 = vector.extract_strided_slice %2 {offsets = [0, 5], sizes = [16, 1], strides = [1, 1]} : vector<16x32xf32> to vector<16x1xf32>
    %32 = vector.extract_strided_slice %5 {offsets = [0, 640], sizes = [16, 128], strides = [1, 1]} : vector<16x1024xf32> to vector<16x128xf32>
    %33 = vector.broadcast %31 : vector<16x1xf32> to vector<16x128xf32>
    %34 = arith.mulf %33, %32 : vector<16x128xf32>
    %35 = arith.addf %30, %34 : vector<16x128xf32>
    %36 = vector.extract_strided_slice %2 {offsets = [0, 6], sizes = [16, 1], strides = [1, 1]} : vector<16x32xf32> to vector<16x1xf32>
    %37 = vector.extract_strided_slice %5 {offsets = [0, 768], sizes = [16, 128], strides = [1, 1]} : vector<16x1024xf32> to vector<16x128xf32>
    %38 = vector.broadcast %36 : vector<16x1xf32> to vector<16x128xf32>
    %39 = arith.mulf %38, %37 : vector<16x128xf32>
    %40 = arith.addf %35, %39 : vector<16x128xf32>
    %41 = vector.extract_strided_slice %2 {offsets = [0, 7], sizes = [16, 1], strides = [1, 1]} : vector<16x32xf32> to vector<16x1xf32>
    %42 = vector.extract_strided_slice %5 {offsets = [0, 896], sizes = [16, 128], strides = [1, 1]} : vector<16x1024xf32> to vector<16x128xf32>
    %43 = vector.broadcast %41 : vector<16x1xf32> to vector<16x128xf32>
    %44 = arith.mulf %43, %42 : vector<16x128xf32>
    %45 = arith.addf %40, %44 : vector<16x128xf32>
    %c0_6 = arith.constant 0 : index
    %c1024 = arith.constant 1024 : index
    %46 = vector.load %arg3[%c0_6, %c1024] : memref<128x4096xbf16, #tpu.memory_space<vmem>>, vector<128x1024xbf16>
    %cst_7 = arith.constant dense<0.000000e+00> : vector<16x1024xf32>
    %47 = tpu.matmul %1, %46, %cst_7 {dimension_numbers = #tpu.dot_dimension_numbers<[1], [0], [0], [1], [0, 0, 1, 1], [], []>} : vector<16x128xbf16>, vector<128x1024xbf16>, vector<16x1024xf32> -> vector<16x1024xf32>
    %48 = vector.extract_strided_slice %2 {offsets = [0, 8], sizes = [16, 1], strides = [1, 1]} : vector<16x32xf32> to vector<16x1xf32>
    %49 = vector.extract_strided_slice %47 {offsets = [0, 0], sizes = [16, 128], strides = [1, 1]} : vector<16x1024xf32> to vector<16x128xf32>
    %50 = vector.broadcast %48 : vector<16x1xf32> to vector<16x128xf32>
    %51 = arith.mulf %50, %49 : vector<16x128xf32>
    %52 = arith.addf %45, %51 : vector<16x128xf32>
    %53 = vector.extract_strided_slice %2 {offsets = [0, 9], sizes = [16, 1], strides = [1, 1]} : vector<16x32xf32> to vector<16x1xf32>
    %54 = vector.extract_strided_slice %47 {offsets = [0, 128], sizes = [16, 128], strides = [1, 1]} : vector<16x1024xf32> to vector<16x128xf32>
    %55 = vector.broadcast %53 : vector<16x1xf32> to vector<16x128xf32>
    %56 = arith.mulf %55, %54 : vector<16x128xf32>
    %57 = arith.addf %52, %56 : vector<16x128xf32>
    %58 = vector.extract_strided_slice %2 {offsets = [0, 10], sizes = [16, 1], strides = [1, 1]} : vector<16x32xf32> to vector<16x1xf32>
    %59 = vector.extract_strided_slice %47 {offsets = [0, 256], sizes = [16, 128], strides = [1, 1]} : vector<16x1024xf32> to vector<16x128xf32>
    %60 = vector.broadcast %58 : vector<16x1xf32> to vector<16x128xf32>
    %61 = arith.mulf %60, %59 : vector<16x128xf32>
    %62 = arith.addf %57, %61 : vector<16x128xf32>
    %63 = vector.extract_strided_slice %2 {offsets = [0, 11], sizes = [16, 1], strides = [1, 1]} : vector<16x32xf32> to vector<16x1xf32>
    %64 = vector.extract_strided_slice %47 {offsets = [0, 384], sizes = [16, 128], strides = [1, 1]} : vector<16x1024xf32> to vector<16x128xf32>
    %65 = vector.broadcast %63 : vector<16x1xf32> to vector<16x128xf32>
    %66 = arith.mulf %65, %64 : vector<16x128xf32>
    %67 = arith.addf %62, %66 : vector<16x128xf32>
    %68 = vector.extract_strided_slice %2 {offsets = [0, 12], sizes = [16, 1], strides = [1, 1]} : vector<16x32xf32> to vector<16x1xf32>
    %69 = vector.extract_strided_slice %47 {offsets = [0, 512], sizes = [16, 128], strides = [1, 1]} : vector<16x1024xf32> to vector<16x128xf32>
    %70 = vector.broadcast %68 : vector<16x1xf32> to vector<16x128xf32>
    %71 = arith.mulf %70, %69 : vector<16x128xf32>
    %72 = arith.addf %67, %71 : vector<16x128xf32>
    %73 = vector.extract_strided_slice %2 {offsets = [0, 13], sizes = [16, 1], strides = [1, 1]} : vector<16x32xf32> to vector<16x1xf32>
    %74 = vector.extract_strided_slice %47 {offsets = [0, 640], sizes = [16, 128], strides = [1, 1]} : vector<16x1024xf32> to vector<16x128xf32>
    %75 = vector.broadcast %73 : vector<16x1xf32> to vector<16x128xf32>
    %76 = arith.mulf %75, %74 : vector<16x128xf32>
    %77 = arith.addf %72, %76 : vector<16x128xf32>
    %78 = vector.extract_strided_slice %2 {offsets = [0, 14], sizes = [16, 1], strides = [1, 1]} : vector<16x32xf32> to vector<16x1xf32>
    %79 = vector.extract_strided_slice %47 {offsets = [0, 768], sizes = [16, 128], strides = [1, 1]} : vector<16x1024xf32> to vector<16x128xf32>
    %80 = vector.broadcast %78 : vector<16x1xf32> to vector<16x128xf32>
    %81 = arith.mulf %80, %79 : vector<16x128xf32>
    %82 = arith.addf %77, %81 : vector<16x128xf32>
    %83 = vector.extract_strided_slice %2 {offsets = [0, 15], sizes = [16, 1], strides = [1, 1]} : vector<16x32xf32> to vector<16x1xf32>
    %84 = vector.extract_strided_slice %47 {offsets = [0, 896], sizes = [16, 128], strides = [1, 1]} : vector<16x1024xf32> to vector<16x128xf32>
    %85 = vector.broadcast %83 : vector<16x1xf32> to vector<16x128xf32>
    %86 = arith.mulf %85, %84 : vector<16x128xf32>
    %87 = arith.addf %82, %86 : vector<16x128xf32>
    %c0_8 = arith.constant 0 : index
    %c2048 = arith.constant 2048 : index
    %88 = vector.load %arg3[%c0_8, %c2048] : memref<128x4096xbf16, #tpu.memory_space<vmem>>, vector<128x1024xbf16>
    %cst_9 = arith.constant dense<0.000000e+00> : vector<16x1024xf32>
    %89 = tpu.matmul %1, %88, %cst_9 {dimension_numbers = #tpu.dot_dimension_numbers<[1], [0], [0], [1], [0, 0, 1, 1], [], []>} : vector<16x128xbf16>, vector<128x1024xbf16>, vector<16x1024xf32> -> vector<16x1024xf32>
    %90 = vector.extract_strided_slice %2 {offsets = [0, 16], sizes = [16, 1], strides = [1, 1]} : vector<16x32xf32> to vector<16x1xf32>
    %91 = vector.extract_strided_slice %89 {offsets = [0, 0], sizes = [16, 128], strides = [1, 1]} : vector<16x1024xf32> to vector<16x128xf32>
    %92 = vector.broadcast %90 : vector<16x1xf32> to vector<16x128xf32>
    %93 = arith.mulf %92, %91 : vector<16x128xf32>
    %94 = arith.addf %87, %93 : vector<16x128xf32>
    %95 = vector.extract_strided_slice %2 {offsets = [0, 17], sizes = [16, 1], strides = [1, 1]} : vector<16x32xf32> to vector<16x1xf32>
    %96 = vector.extract_strided_slice %89 {offsets = [0, 128], sizes = [16, 128], strides = [1, 1]} : vector<16x1024xf32> to vector<16x128xf32>
    %97 = vector.broadcast %95 : vector<16x1xf32> to vector<16x128xf32>
    %98 = arith.mulf %97, %96 : vector<16x128xf32>
    %99 = arith.addf %94, %98 : vector<16x128xf32>
    %100 = vector.extract_strided_slice %2 {offsets = [0, 18], sizes = [16, 1], strides = [1, 1]} : vector<16x32xf32> to vector<16x1xf32>
    %101 = vector.extract_strided_slice %89 {offsets = [0, 256], sizes = [16, 128], strides = [1, 1]} : vector<16x1024xf32> to vector<16x128xf32>
    %102 = vector.broadcast %100 : vector<16x1xf32> to vector<16x128xf32>
    %103 = arith.mulf %102, %101 : vector<16x128xf32>
    %104 = arith.addf %99, %103 : vector<16x128xf32>
    %105 = vector.extract_strided_slice %2 {offsets = [0, 19], sizes = [16, 1], strides = [1, 1]} : vector<16x32xf32> to vector<16x1xf32>
    %106 = vector.extract_strided_slice %89 {offsets = [0, 384], sizes = [16, 128], strides = [1, 1]} : vector<16x1024xf32> to vector<16x128xf32>
    %107 = vector.broadcast %105 : vector<16x1xf32> to vector<16x128xf32>
    %108 = arith.mulf %107, %106 : vector<16x128xf32>
    %109 = arith.addf %104, %108 : vector<16x128xf32>
    %110 = vector.extract_strided_slice %2 {offsets = [0, 20], sizes = [16, 1], strides = [1, 1]} : vector<16x32xf32> to vector<16x1xf32>
    %111 = vector.extract_strided_slice %89 {offsets = [0, 512], sizes = [16, 128], strides = [1, 1]} : vector<16x1024xf32> to vector<16x128xf32>
    %112 = vector.broadcast %110 : vector<16x1xf32> to vector<16x128xf32>
    %113 = arith.mulf %112, %111 : vector<16x128xf32>
    %114 = arith.addf %109, %113 : vector<16x128xf32>
    %115 = vector.extract_strided_slice %2 {offsets = [0, 21], sizes = [16, 1], strides = [1, 1]} : vector<16x32xf32> to vector<16x1xf32>
    %116 = vector.extract_strided_slice %89 {offsets = [0, 640], sizes = [16, 128], strides = [1, 1]} : vector<16x1024xf32> to vector<16x128xf32>
    %117 = vector.broadcast %115 : vector<16x1xf32> to vector<16x128xf32>
    %118 = arith.mulf %117, %116 : vector<16x128xf32>
    %119 = arith.addf %114, %118 : vector<16x128xf32>
    %120 = vector.extract_strided_slice %2 {offsets = [0, 22], sizes = [16, 1], strides = [1, 1]} : vector<16x32xf32> to vector<16x1xf32>
    %121 = vector.extract_strided_slice %89 {offsets = [0, 768], sizes = [16, 128], strides = [1, 1]} : vector<16x1024xf32> to vector<16x128xf32>
    %122 = vector.broadcast %120 : vector<16x1xf32> to vector<16x128xf32>
    %123 = arith.mulf %122, %121 : vector<16x128xf32>
    %124 = arith.addf %119, %123 : vector<16x128xf32>
    %125 = vector.extract_strided_slice %2 {offsets = [0, 23], sizes = [16, 1], strides = [1, 1]} : vector<16x32xf32> to vector<16x1xf32>
    %126 = vector.extract_strided_slice %89 {offsets = [0, 896], sizes = [16, 128], strides = [1, 1]} : vector<16x1024xf32> to vector<16x128xf32>
    %127 = vector.broadcast %125 : vector<16x1xf32> to vector<16x128xf32>
    %128 = arith.mulf %127, %126 : vector<16x128xf32>
    %129 = arith.addf %124, %128 : vector<16x128xf32>
    %c0_10 = arith.constant 0 : index
    %c3072 = arith.constant 3072 : index
    %130 = vector.load %arg3[%c0_10, %c3072] : memref<128x4096xbf16, #tpu.memory_space<vmem>>, vector<128x1024xbf16>
    %cst_11 = arith.constant dense<0.000000e+00> : vector<16x1024xf32>
    %131 = tpu.matmul %1, %130, %cst_11 {dimension_numbers = #tpu.dot_dimension_numbers<[1], [0], [0], [1], [0, 0, 1, 1], [], []>} : vector<16x128xbf16>, vector<128x1024xbf16>, vector<16x1024xf32> -> vector<16x1024xf32>
    %132 = vector.extract_strided_slice %2 {offsets = [0, 24], sizes = [16, 1], strides = [1, 1]} : vector<16x32xf32> to vector<16x1xf32>
    %133 = vector.extract_strided_slice %131 {offsets = [0, 0], sizes = [16, 128], strides = [1, 1]} : vector<16x1024xf32> to vector<16x128xf32>
    %134 = vector.broadcast %132 : vector<16x1xf32> to vector<16x128xf32>
    %135 = arith.mulf %134, %133 : vector<16x128xf32>
    %136 = arith.addf %129, %135 : vector<16x128xf32>
    %137 = vector.extract_strided_slice %2 {offsets = [0, 25], sizes = [16, 1], strides = [1, 1]} : vector<16x32xf32> to vector<16x1xf32>
    %138 = vector.extract_strided_slice %131 {offsets = [0, 128], sizes = [16, 128], strides = [1, 1]} : vector<16x1024xf32> to vector<16x128xf32>
    %139 = vector.broadcast %137 : vector<16x1xf32> to vector<16x128xf32>
    %140 = arith.mulf %139, %138 : vector<16x128xf32>
    %141 = arith.addf %136, %140 : vector<16x128xf32>
    %142 = vector.extract_strided_slice %2 {offsets = [0, 26], sizes = [16, 1], strides = [1, 1]} : vector<16x32xf32> to vector<16x1xf32>
    %143 = vector.extract_strided_slice %131 {offsets = [0, 256], sizes = [16, 128], strides = [1, 1]} : vector<16x1024xf32> to vector<16x128xf32>
    %144 = vector.broadcast %142 : vector<16x1xf32> to vector<16x128xf32>
    %145 = arith.mulf %144, %143 : vector<16x128xf32>
    %146 = arith.addf %141, %145 : vector<16x128xf32>
    %147 = vector.extract_strided_slice %2 {offsets = [0, 27], sizes = [16, 1], strides = [1, 1]} : vector<16x32xf32> to vector<16x1xf32>
    %148 = vector.extract_strided_slice %131 {offsets = [0, 384], sizes = [16, 128], strides = [1, 1]} : vector<16x1024xf32> to vector<16x128xf32>
    %149 = vector.broadcast %147 : vector<16x1xf32> to vector<16x128xf32>
    %150 = arith.mulf %149, %148 : vector<16x128xf32>
    %151 = arith.addf %146, %150 : vector<16x128xf32>
    %152 = vector.extract_strided_slice %2 {offsets = [0, 28], sizes = [16, 1], strides = [1, 1]} : vector<16x32xf32> to vector<16x1xf32>
    %153 = vector.extract_strided_slice %131 {offsets = [0, 512], sizes = [16, 128], strides = [1, 1]} : vector<16x1024xf32> to vector<16x128xf32>
    %154 = vector.broadcast %152 : vector<16x1xf32> to vector<16x128xf32>
    %155 = arith.mulf %154, %153 : vector<16x128xf32>
    %156 = arith.addf %151, %155 : vector<16x128xf32>
    %157 = vector.extract_strided_slice %2 {offsets = [0, 29], sizes = [16, 1], strides = [1, 1]} : vector<16x32xf32> to vector<16x1xf32>
    %158 = vector.extract_strided_slice %131 {offsets = [0, 640], sizes = [16, 128], strides = [1, 1]} : vector<16x1024xf32> to vector<16x128xf32>
    %159 = vector.broadcast %157 : vector<16x1xf32> to vector<16x128xf32>
    %160 = arith.mulf %159, %158 : vector<16x128xf32>
    %161 = arith.addf %156, %160 : vector<16x128xf32>
    %162 = vector.extract_strided_slice %2 {offsets = [0, 30], sizes = [16, 1], strides = [1, 1]} : vector<16x32xf32> to vector<16x1xf32>
    %163 = vector.extract_strided_slice %131 {offsets = [0, 768], sizes = [16, 128], strides = [1, 1]} : vector<16x1024xf32> to vector<16x128xf32>
    %164 = vector.broadcast %162 : vector<16x1xf32> to vector<16x128xf32>
    %165 = arith.mulf %164, %163 : vector<16x128xf32>
    %166 = arith.addf %161, %165 : vector<16x128xf32>
    %167 = vector.extract_strided_slice %2 {offsets = [0, 31], sizes = [16, 1], strides = [1, 1]} : vector<16x32xf32> to vector<16x1xf32>
    %168 = vector.extract_strided_slice %131 {offsets = [0, 896], sizes = [16, 128], strides = [1, 1]} : vector<16x1024xf32> to vector<16x128xf32>
    %169 = vector.broadcast %167 : vector<16x1xf32> to vector<16x128xf32>
    %170 = arith.mulf %169, %168 : vector<16x128xf32>
    %171 = arith.addf %166, %170 : vector<16x128xf32>
    %c0_12 = arith.constant 0 : index
    %c0_13 = arith.constant 0 : index
    %172 = vector.load %arg4[%c0_12, %c0_13] : memref<16x128xf32, #tpu.memory_space<vmem>>, vector<16x128xf32>
    tpu.vector_store %arg4[%c0_12, %c0_13], %171 {strides = array<i32>} : memref<16x128xf32, #tpu.memory_space<vmem>>, vector<16x128xf32>,
    return
  }
  func.func @transform_0(%arg0: i32) -> (i32, i32) {
    %c0_i32 = arith.constant 0 : i32
    %c0_i32_0 = arith.constant 0 : i32
    %c0_i32_1 = arith.constant 0 : i32
    return %c0_i32, %c0_i32_0 : i32, i32
  }
  func.func @transform_1(%arg0: i32) -> (i32, i32) {
    %c0_i32 = arith.constant 0 : i32
    %c0_i32_0 = arith.constant 0 : i32
    %c0_i32_1 = arith.constant 0 : i32
    return %c0_i32, %c0_i32_0 : i32, i32
  }
  func.func @transform_2(%arg0: i32) -> (i32, i32) {
    %c0_i32 = arith.constant 0 : i32
    %c0_i32_0 = arith.constant 0 : i32
    %c0_i32_1 = arith.constant 0 : i32
    return %c0_i32, %c0_i32_0 : i32, i32
  }
  func.func @transform_3(%arg0: i32) -> (i32, i32) {
    %c0_i32 = arith.constant 0 : i32
    %c0_i32_0 = arith.constant 0 : i32
    %c0_i32_1 = arith.constant 0 : i32
    return %c0_i32, %c0_i32_0 : i32, i32
  }
}

</mosaic_0001>

<bundles_post_ra>
// kernel: tpu_custom_call.1
= control target key start
LH: loop header
LB: loop body
LE: loop exit
PB: predicated region body
PF: predicated region fallthrough
CT: control target
= control target key end

     0   :  { %8 = vsyncpa [#allocation3], 0  ;;  %s3406_s0 = inlined_call_operand.hbm [shape: f32[16,128], index: 0, kind: input, shape index: {}]   ;;  %s3407_s1 = inlined_call_operand.hbm [shape: f32[16,32], index: 1, kind: input, shape index: {}]   ;;  %s3408_s2 = inlined_call_operand.hbm [shape: bf16[128,4096], index: 2, kind: input, shape index: {}]   ;;  %s3409_s3 = inlined_call_operand.hbm [shape: f32[16,128], index: 3, kind: output, shape index: {}]  }
   0x1   :  { %9 = vsyncpa [#allocation6], 0 }
   0x2   :  { %10 = vsyncpa [#allocation4], 0  ;;  %s3136_s12 = smov [#allocation5]   ;;  %s3137_s14 = smov [#allocation2]  }
   0x3   :  { %s28_s13 = sshll.u32 %s3136_s12, 4  ;;  %s16_s15 = sshll.u32 %s3137_s14, 4  ;;  %s29_s13 = int_to_ptr.vmem [resolvable:$true] %s28_s13  ;;  %s3195_s15 = int_to_ptr.vmem [resolvable:$true] %s16_s15 }
   0x4   :  { %s3042_s18 = scalar_lea.hbm %s3407_s1, 256 }
   0x5   :  { %p3043_p0 = scmp.ne.s32.totalorder %s3407_s1, %s3042_s18  ;;  %p3046_p1 = scmp.lt.u32.totalorder %s3042_s18, %s3407_s1 }
   0x7   :  { %p3048_p2 = pnand %p3046_p1, %p3043_p0 }
   0x9   :  { %3051 = shalt.err (!%p3048_p2)
}
   0xa   :  { %s3052_s23 = scalar_lea.vmem %s29_s13, 256  ;;  %p3057_p4 = scmp.lt.s32.totalorder %s29_s13, %s29_s13 }
   0xb   :  { %p3053_p3 = scmp.ne.s32.totalorder %s29_s13, %s3052_s23  ;;  %p3058_p5 = scmp.lt.s32.totalorder %s3052_s23, %s3052_s23 }
   0xd   :  { %p3059_p6 = por %p3058_p5, %p3057_p4 }
   0xf   :  { %p3060_p7 = pnand %p3059_p6, %p3053_p3 }
  0x11   :  { %3063 = shalt.err (!%p3060_p7)
}
  0x12   :  { %s3138_s24 = smov 128   ;;  %s3139_s25 = smov 8  }
  0x13   :  { %34 = dma.hbm_to_vmem [thread:$0]  %s3407_s1, 256, %s29_s13, [#allocation6], %s3138_s24, %s3138_s24, %s3139_s25  }
  0x14   :  { %s3064_s30 = scalar_lea.hbm %s3406_s0, 256 }
  0x15   :  { %p3065_p8 = scmp.ne.s32.totalorder %s3406_s0, %s3064_s30  ;;  %p3068_p9 = scmp.lt.u32.totalorder %s3064_s30, %s3406_s0 }
  0x17   :  { %p3070_p10 = pnand %p3068_p9, %p3065_p8 }
  0x19   :  { %3073 = shalt.err (!%p3070_p10)
}
  0x1a   :  { %s3074_s8 = scalar_lea.vmem %s3195_s15, 256  ;;  %p3079_p12 = scmp.lt.s32.totalorder %s3195_s15, %s3195_s15 }
  0x1b   :  { %p3075_p11 = scmp.ne.s32.totalorder %s3195_s15, %s3074_s8  ;;  %p3080_p13 = scmp.lt.s32.totalorder %s3074_s8, %s3074_s8 }
  0x1d   :  { %p3081_p0 = por %p3080_p13, %p3079_p12 }
  0x1f   :  { %p3082_p1 = pnand %p3081_p0, %p3075_p11 }
  0x21   :  { %3085 = shalt.err (!%p3082_p1)
}
  0x22   :  { %22 = dma.hbm_to_vmem [thread:$0]  %s3406_s0, 256, %s3195_s15, [#allocation3], %s3138_s24, %s3138_s24, %s3139_s25  }
  0x23   :  { %s3140_s10 = smov [#allocation7]   ;;  %s3086_s14 = scalar_lea.hbm %s3408_s2, 32768 }
  0x24   :  { %s40_s11 = sshll.u32 %s3140_s10, 4  ;;  %p3087_p2 = scmp.ne.s32.totalorder %s3408_s2, %s3086_s14  ;;  %s41_s11 = int_to_ptr.vmem [resolvable:$true] %s40_s11 }
  0x25   :  { %p3090_p3 = scmp.lt.u32.totalorder %s3086_s14, %s3408_s2 }
  0x27   :  { %p3092_p4 = pnand %p3090_p3, %p3087_p2 }
  0x29   :  { %3095 = shalt.err (!%p3092_p4)
}
  0x2a   :  { %s3096_s20 = scalar_lea.vmem %s41_s11, 32768  ;;  %p3101_p6 = scmp.lt.s32.totalorder %s41_s11, %s41_s11 }
  0x2b   :  { %p3097_p5 = scmp.ne.s32.totalorder %s41_s11, %s3096_s20  ;;  %p3102_p7 = scmp.lt.s32.totalorder %s3096_s20, %s3096_s20 }
  0x2d   :  { %p3103_p8 = por %p3102_p7, %p3101_p6 }
  0x2f   :  { %p3104_p9 = pnand %p3103_p8, %p3097_p5 }
  0x31   :  { %3107 = shalt.err (!%p3104_p9)
}
  0x32   :  { %s3141_s0 = smov 2048  }
  0x33   :  { %46 = dma.hbm_to_vmem [thread:$0]  %s3408_s2, 32768, %s41_s11, [#allocation6], %s3141_s0, %s3141_s0, %s3138_s24  }
  0x34   :  { %3130 = dma.done.wait [#allocation3], 256  }
  0x35   :  { %3131 = vsyncadd [#allocation3], 4294967040 }
  0x36   :  { %3132 = dma.done.wait [#allocation6], 33024  }
  0x37   :  { %3133 = vsyncadd [#allocation6], 4294934272  ;;  %v3142_v0 = vmov 0   ;;  %v3143_v1 = vmov 1   ;;  %v62_v2 = vld [vmem:[#allocation7] sm:$0xff]  ;;  %v63_v4 = vld [vmem:[#allocation7 + $0x8] sm:$0xff] }
  0x38   :  { %478 = vmatprep.mubr.bf16.mxu0 %v3142_v0  ;;  %521 = vmatprep.mubr.bf16.mxu1 %v3142_v0  ;;  %v66_v3 = vld [vmem:[#allocation7 + $0x80] sm:$0xff]  ;;  %v67_v6 = vld [vmem:[#allocation7 + $0x88] sm:$0xff]  ;;  %s3174_s2 = smov [#allocation8]  }
  0x39   :  { %2988 = vset.pattern.permute.xlu1 %v3143_v1  ;;  %2987 = vset.pattern.permute.xlu0 %v3142_v0  ;;  %v2693_v5 = vcombine.high %v62_v2, %v66_v3  ;;  %v2692_v7 = vcombine.low %v62_v2, %v66_v3  ;;  %v70_v8 = vld [vmem:[#allocation7 + $0x100] sm:$0xff]  ;;  %v2695_v10 = vcombine.high %v63_v4, %v67_v6  ;;  %v71_v13 = vld [vmem:[#allocation7 + $0x108] sm:$0xff]  ;;  %v64_v1 = vld [vmem:[#allocation7 + $0x10] sm:$0xff]  ;;  %s2679_s22 = sshll.u32 %s3174_s2, 4  ;;  %s2680_s22 = int_to_ptr.vmem [resolvable:$true] %s2679_s22 }
  0x3a   :  { %v74_v9 = vld [vmem:[#allocation7 + $0x180] sm:$0xff]  ;;  %v2694_v11 = vcombine.low %v63_v4, %v67_v6  ;;  %v75_v14 = vld [vmem:[#allocation7 + $0x188] sm:$0xff]  ;;  %v68_v2 = vld [vmem:[#allocation7 + $0x90] sm:$0xff]  ;;  %s3108_s23 = scalar_lea.vmem %s2680_s22, 256  ;;  %p3113_p11 = scmp.lt.s32.totalorder %s2680_s22, %s2680_s22 }
  0x3b   :  { %v2701_v12 = vcombine.high %v70_v8, %v74_v9  ;;  %v78_v15 = vld [vmem:[#allocation7 + $0x200] sm:$0xff]  ;;  %446 = vmatprep.subr.bf16.mxu0 %v2693_v5  ;;  %v2703_v16 = vcombine.high %v71_v13, %v75_v14  ;;  %v79_v18 = vld [vmem:[#allocation7 + $0x208] sm:$0xff]  ;;  %489 = vmatprep.subr.bf16.mxu1 %v2695_v10  ;;  %v2700_v20 = vcombine.low %v70_v8, %v74_v9  ;;  %v65_v3 = vld [vmem:[#allocation7 + $0x18] sm:$0xff]  ;;  %p3109_p10 = scmp.ne.s32.totalorder %s2680_s22, %s3108_s23  ;;  %p3114_p12 = scmp.lt.s32.totalorder %s3108_s23, %s3108_s23 }
  0x3c   :  { %v82_v17 = vld [vmem:[#allocation7 + $0x280] sm:$0xff]  ;;  %v83_v19 = vld [vmem:[#allocation7 + $0x288] sm:$0xff]  ;;  %447 = vmatpush1.bf16.msra.mxu0 %v2692_v7  ;;  %490 = vmatpush1.bf16.msra.mxu1 %v2694_v11  ;;  %v2702_v21 = vcombine.low %v71_v13, %v75_v14  ;;  %v69_v4 = vld [vmem:[#allocation7 + $0x98] sm:$0xff]  ;;  %v2697_v9 = vcombine.high %v64_v1, %v68_v2 }
  0x3d   :  { %448 = vmatprep.subr.bf16.mxu0 %v2701_v12  ;;  %v2709_v22 = vcombine.high %v78_v15, %v82_v17  ;;  %491 = vmatprep.subr.bf16.mxu1 %v2703_v16  ;;  %v2711_v23 = vcombine.high %v79_v18, %v83_v19  ;;  %v86_v24 = vld [vmem:[#allocation7 + $0x300] sm:$0xff]  ;;  %v87_v26 = vld [vmem:[#allocation7 + $0x308] sm:$0xff]  ;;  %v2708_v28 = vcombine.low %v78_v15, %v82_v17  ;;  %v72_v11 = vld [vmem:[#allocation7 + $0x110] sm:$0xff]  ;;  %p3115_p13 = por %p3114_p12, %p3113_p11 }
  0x3e   :  { %v90_v25 = vld [vmem:[#allocation7 + $0x380] sm:$0xff]  ;;  %v91_v27 = vld [vmem:[#allocation7 + $0x388] sm:$0xff]  ;;  %v2710_v29 = vcombine.low %v79_v18, %v83_v19  ;;  %v2699_v10 = vcombine.high %v65_v3, %v69_v4  ;;  %v76_v12 = vld [vmem:[#allocation7 + $0x190] sm:$0xff]  ;;  %v2696_v16 = vcombine.low %v64_v1, %v68_v2  ;;  %v2698_v17 = vcombine.low %v65_v3, %v69_v4 }
  0x3f   :  { %v2717_v30 = vcombine.high %v86_v24, %v90_v25  ;;  %v2719_v31 = vcombine.high %v87_v26, %v91_v27  ;;  %v94_v32 = vld [vmem:[#allocation7 + $0x400] sm:$0xff]  ;;  %v95_v34 = vld [vmem:[#allocation7 + $0x408] sm:$0xff]  ;;  %v2716_v36 = vcombine.low %v86_v24, %v90_v25  ;;  %v2718_v37 = vcombine.low %v87_v26, %v91_v27  ;;  %v73_v14 = vld [vmem:[#allocation7 + $0x118] sm:$0xff]  ;;  %p3116_p0 = pnand %p3115_p13, %p3109_p10 }
  0x40   :  { %449 = vmatpush1.bf16.msra.mxu0 %v2700_v20  ;;  %492 = vmatpush1.bf16.msra.mxu1 %v2702_v21  ;;  %v98_v33 = vld [vmem:[#allocation7 + $0x480] sm:$0xff]  ;;  %v99_v35 = vld [vmem:[#allocation7 + $0x488] sm:$0xff]  ;;  %v77_v15 = vld [vmem:[#allocation7 + $0x198] sm:$0xff]  ;;  %v2705_v18 = vcombine.high %v72_v11, %v76_v12  ;;  %v2704_v24 = vcombine.low %v72_v11, %v76_v12  ;;  %v3145_v2 = vmov 3  }
  0x41   :  { %450 = vmatprep.subr.bf16.mxu0 %v2709_v22  ;;  %493 = vmatprep.subr.bf16.mxu1 %v2711_v23  ;;  %v2725_v38 = vcombine.high %v94_v32, %v98_v33  ;;  %v2727_v39 = vcombine.high %v95_v34, %v99_v35  ;;  %v102_v40 = vld [vmem:[#allocation7 + $0x500] sm:$0xff]  ;;  %v103_v42 = vld [vmem:[#allocation7 + $0x508] sm:$0xff]  ;;  %v2724_v44 = vcombine.low %v94_v32, %v98_v33  ;;  %v80_v20 = vld [vmem:[#allocation7 + $0x210] sm:$0xff] }
  0x42   :  { %v106_v41 = vld [vmem:[#allocation7 + $0x580] sm:$0xff]  ;;  %v107_v43 = vld [vmem:[#allocation7 + $0x588] sm:$0xff]  ;;  %v2726_v45 = vcombine.low %v95_v34, %v99_v35  ;;  %v2707_v19 = vcombine.high %v73_v14, %v77_v15  ;;  %v84_v21 = vld [vmem:[#allocation7 + $0x290] sm:$0xff]  ;;  %v2706_v26 = vcombine.low %v73_v14, %v77_v15  ;;  %v3146_v14 = vmov 4  }
  0x43   :  { %v2733_v46 = vcombine.high %v102_v40, %v106_v41  ;;  %v2735_v47 = vcombine.high %v103_v42, %v107_v43  ;;  %v110_v48 = vld [vmem:[#allocation7 + $0x600] sm:$0xff]  ;;  %v111_v50 = vld [vmem:[#allocation7 + $0x608] sm:$0xff]  ;;  %v2732_v52 = vcombine.low %v102_v40, %v106_v41  ;;  %v2734_v53 = vcombine.low %v103_v42, %v107_v43  ;;  %v81_v22 = vld [vmem:[#allocation7 + $0x218] sm:$0xff] }
  0x44   :  { %451 = vmatpush1.bf16.msra.mxu0 %v2708_v28  ;;  %494 = vmatpush1.bf16.msra.mxu1 %v2710_v29  ;;  %v114_v49 = vld [vmem:[#allocation7 + $0x680] sm:$0xff]  ;;  %v115_v51 = vld [vmem:[#allocation7 + $0x688] sm:$0xff]  ;;  %v85_v23 = vld [vmem:[#allocation7 + $0x298] sm:$0xff]  ;;  %v2713_v27 = vcombine.high %v80_v20, %v84_v21  ;;  %v2712_v33 = vcombine.low %v80_v20, %v84_v21  ;;  %v3147_v21 = vmov 5  }
  0x45   :  { %452 = vmatprep.subr.bf16.mxu0 %v2717_v30  ;;  %495 = vmatprep.subr.bf16.mxu1 %v2719_v31  ;;  %v2741_v54 = vcombine.high %v110_v48, %v114_v49  ;;  %v2743_v55 = vcombine.high %v111_v50, %v115_v51  ;;  %v118_v56 = vld [vmem:[#allocation7 + $0x700] sm:$0xff]  ;;  %v119_v58 = vld [vmem:[#allocation7 + $0x708] sm:$0xff]  ;;  %v2740_v60 = vcombine.low %v110_v48, %v114_v49  ;;  %v3252_v25 = vld [vmem:[#allocation5] sm:$0xff] }
  0x46   :  { %v122_v57 = vld [vmem:[#allocation7 + $0x780] sm:$0xff]  ;;  %v123_v59 = vld [vmem:[#allocation7 + $0x788] sm:$0xff]  ;;  %v2742_v61 = vcombine.low %v111_v50, %v115_v51  ;;  %v2715_v28 = vcombine.high %v81_v22, %v85_v23  ;;  %v88_v29 = vld [vmem:[#allocation7 + $0x310] sm:$0xff]  ;;  %633 = vperm.xlu1 %2988, %v3252_v25   ;;  %620 = vperm.xlu0 %2987, %v3252_v25   ;;  %v2714_v35 = vcombine.low %v81_v22, %v85_v23  ;;  %v3144_v50 = vmov 2  }
  0x47   :  { %v2749_v62 = vcombine.high %v118_v56, %v122_v57  ;;  %v2751_v63 = vcombine.high %v119_v58, %v123_v59  ;;  %v2748_v5 = vcombine.low %v118_v56, %v122_v57  ;;  %v57_v6 = vld [vmem:[#allocation2] sm:$0xff]  ;;  %v58_v7 = vld [vmem:[#allocation2 + $0x8] sm:$0xff]  ;;  %v2750_v8 = vcombine.low %v119_v58, %v123_v59  ;;  %v92_v30 = vld [vmem:[#allocation7 + $0x390] sm:$0xff] }
  0x48   :  { %453 = vmatpush1.bf16.msra.mxu0 %v2716_v36  ;;  %496 = vmatpush1.bf16.msra.mxu1 %v2718_v37  ;;  %v3248_v13 = vpack.c.bf16 %v58_v7, %v57_v6  ;;  %v89_v31 = vld [vmem:[#allocation7 + $0x318] sm:$0xff]  ;;  %v2721_v36 = vcombine.high %v88_v29, %v92_v30  ;;  %v2720_v42 = vcombine.low %v88_v29, %v92_v30  ;;  %v116_v56 = vld [vmem:[#allocation7 + $0x690] sm:$0xff]  ;;  %v717_v11 = vld [vmem:[#allocation7 + $0x28] sm:$0xff] }
  0x49   :  { %454 = vmatprep.subr.bf16.mxu0 %v2725_v38  ;;  %497 = vmatprep.subr.bf16.mxu1 %v2727_v39  ;;  %v93_v32 = vld [vmem:[#allocation7 + $0x398] sm:$0xff]  ;;  %v96_v38 = vld [vmem:[#allocation7 + $0x410] sm:$0xff]  ;;  %v721_v12 = vld [vmem:[#allocation7 + $0xa8] sm:$0xff] }
  0x4a   :  { %v3258_v34 = vld [vmem:[#allocation5 + $0x8] sm:$0xff]  ;;  %v2723_v37 = vcombine.high %v89_v31, %v93_v32  ;;  %v100_v39 = vld [vmem:[#allocation7 + $0x490] sm:$0xff]  ;;  %v2722_v43 = vcombine.low %v89_v31, %v93_v32  ;;  %v728_v20 = vld [vmem:[#allocation7 + $0x1a0] sm:$0xff] }
  0x4b   :  { %v97_v40 = vld [vmem:[#allocation7 + $0x418] sm:$0xff]  ;;  %637 = vperm.xlu1 %2988, %v3258_v34   ;;  %625 = vperm.xlu0 %2987, %v3258_v34   ;;  %v2728_v51 = vcombine.low %v96_v38, %v100_v39  ;;  %v124_v1 = vld [vmem:[#allocation7 + $0x790] sm:$0xff]  ;;  %v725_v22 = vld [vmem:[#allocation7 + $0x128] sm:$0xff] }
  0x4c   :  { %455 = vmatpush1.bf16.msra.mxu0 %v2724_v44  ;;  %498 = vmatpush1.bf16.msra.mxu1 %v2726_v45  ;;  %v101_v41 = vld [vmem:[#allocation7 + $0x498] sm:$0xff]  ;;  %v2729_v44 = vcombine.high %v96_v38, %v100_v39  ;;  %v729_v23 = vld [vmem:[#allocation7 + $0x1a8] sm:$0xff]  ;;  %v732_v29 = vld [vmem:[#allocation7 + $0x220] sm:$0xff] }
  0x4d   :  { %456 = vmatprep.subr.bf16.mxu0 %v2733_v46  ;;  %499 = vmatprep.subr.bf16.mxu1 %v2735_v47  ;;  %v2731_v45 = vcombine.high %v97_v40, %v101_v41  ;;  %v104_v46 = vld [vmem:[#allocation7 + $0x510] sm:$0xff]  ;;  %v105_v48 = vld [vmem:[#allocation7 + $0x518] sm:$0xff]  ;;  %v736_v30 = vld [vmem:[#allocation7 + $0x2a0] sm:$0xff] }
  0x4e   :  { %v108_v47 = vld [vmem:[#allocation7 + $0x590] sm:$0xff]  ;;  %v109_v49 = vld [vmem:[#allocation7 + $0x598] sm:$0xff]  ;;  %v733_v31 = vld [vmem:[#allocation7 + $0x228] sm:$0xff] }
  0x4f   :  { %2990 = vset.pattern.permute.xlu1 %v3144_v50  ;;  %2989 = vset.pattern.permute.xlu0 %v3144_v50  ;;  %v113_v57 = vld [vmem:[#allocation7 + $0x618] sm:$0xff]  ;;  %v2736_v59 = vcombine.low %v104_v46, %v108_v47  ;;  %v737_v32 = vld [vmem:[#allocation7 + $0x2a8] sm:$0xff]  ;;  %v740_v39 = vld [vmem:[#allocation7 + $0x320] sm:$0xff] }
  0x50   :  { %457 = vmatpush1.bf16.msra.mxu0 %v2732_v52  ;;  %500 = vmatpush1.bf16.msra.mxu1 %v2734_v53  ;;  %v2730_v52 = vcombine.low %v97_v40, %v101_v41  ;;  %v2737_v53 = vcombine.high %v104_v46, %v108_v47  ;;  %v117_v58 = vld [vmem:[#allocation7 + $0x698] sm:$0xff]  ;;  %v2775_v38 = vcombine.high %v733_v31, %v737_v32  ;;  %v744_v40 = vld [vmem:[#allocation7 + $0x3a0] sm:$0xff]  ;;  %v741_v41 = vld [vmem:[#allocation7 + $0x328] sm:$0xff] }
  0x51   :  { %458 = vmatprep.subr.bf16.mxu0 %v2741_v54  ;;  %501 = vmatprep.subr.bf16.mxu1 %v2743_v55  ;;  %v2739_v54 = vcombine.high %v105_v48, %v109_v49  ;;  %v112_v55 = vld [vmem:[#allocation7 + $0x610] sm:$0xff]  ;;  %v121_v3 = vld [vmem:[#allocation7 + $0x718] sm:$0xff]  ;;  %v2746_v6 = vcombine.low %v113_v57, %v117_v58  ;;  %v748_v47 = vld [vmem:[#allocation7 + $0x420] sm:$0xff] }
  0x52   :  { %649 = vperm.xlu1 %2990, %v3258_v34   ;;  %645 = vperm.xlu0 %2989, %v3252_v25   ;;  %v125_v4 = vld [vmem:[#allocation7 + $0x798] sm:$0xff]  ;;  %v753_v50 = vld [vmem:[#allocation7 + $0x4a8] sm:$0xff] }
  0x54   :  { %459 = vmatpush1.bf16.msra.mxu0 %v2740_v60  ;;  %502 = vmatpush1.bf16.msra.mxu1 %v2742_v61  ;;  %v2738_v60 = vcombine.low %v105_v48, %v109_v49  ;;  %v2745_v61 = vcombine.high %v112_v55, %v116_v56  ;;  %v752_v48 = vld [vmem:[#allocation7 + $0x4a0] sm:$0xff]  ;;  %v749_v49 = vld [vmem:[#allocation7 + $0x428] sm:$0xff] }
  0x55   :  { %460 = vmatprep.subr.bf16.mxu0 %v2749_v62  ;;  %503 = vmatprep.subr.bf16.mxu1 %v2751_v63  ;;  %v2747_v62 = vcombine.high %v113_v57, %v117_v58  ;;  %v120_v63 = vld [vmem:[#allocation7 + $0x710] sm:$0xff]  ;;  %v757_v57 = vld [vmem:[#allocation7 + $0x528] sm:$0xff] }
  0x56   :  { %2991 = vset.pattern.permute.xlu1 %v3145_v2  ;;  %2992 = vset.pattern.permute.xlu0 %v3145_v2  ;;  %v2753_v7 = vcombine.high %v120_v63, %v124_v1  ;;  %v2752_v15 = vcombine.low %v120_v63, %v124_v1  ;;  %v761_v58 = vld [vmem:[#allocation7 + $0x5a8] sm:$0xff]  ;;  %v764_v1 = vld [vmem:[#allocation7 + $0x620] sm:$0xff] }
  0x57   :  { %657 = vperm.xlu1 %2991, %v3252_v25   ;;  %661 = vperm.xlu0 %2992, %v3258_v34   ;;  %v2799_v63 = vcombine.high %v757_v57, %v761_v58  ;;  %v768_v2 = vld [vmem:[#allocation7 + $0x6a0] sm:$0xff] }
  0x58   :  { %461 = vmatpush1.bf16.msra.mxu0 %v2748_v5  ;;  %504 = vmatpush1.bf16.msra.mxu1 %v2750_v8  ;;  %v2744_v5 = vcombine.low %v112_v55, %v116_v56  ;;  %v2755_v8 = vcombine.high %v121_v3, %v125_v4  ;;  %v756_v55 = vld [vmem:[#allocation7 + $0x520] sm:$0xff] }
  0x59   :  { %532 = vmatprep.subr.bf16.mxu0 %v2697_v9  ;;  %575 = vmatprep.subr.bf16.mxu1 %v2699_v10  ;;  %v716_v9 = vld [vmem:[#allocation7 + $0x20] sm:$0xff] }
  0x5a   :  { %v720_v10 = vld [vmem:[#allocation7 + $0xa0] sm:$0xff] }
  0x5b   :  { %479 = vmatmul.mubr.bf16.vlgmr.msra.gmra.mrb[0].mxu0 %v3248_v13  ;;  %522 = vmatmul.mubr.bf16.vlgmr.msra.gmra.mrb[0].mxu1 %v3248_v13  ;;  %v760_v56 = vld [vmem:[#allocation7 + $0x5a0] sm:$0xff] }
  0x5c   :  { %533 = vmatpush1.bf16.msra.mxu0 %v2696_v16  ;;  %576 = vmatpush1.bf16.msra.mxu1 %v2698_v17  ;;  %v2754_v16 = vcombine.low %v121_v3, %v125_v4  ;;  %v2757_v17 = vcombine.high %v716_v9, %v720_v10  ;;  %v3150_v3 = vmov 7   ;;  %v765_v4 = vld [vmem:[#allocation7 + $0x628] sm:$0xff] }
  0x5d   :  { %534 = vmatprep.subr.bf16.mxu0 %v2705_v18  ;;  %577 = vmatprep.subr.bf16.mxu1 %v2707_v19  ;;  %v2759_v18 = vcombine.high %v717_v11, %v721_v12  ;;  %v724_v19 = vld [vmem:[#allocation7 + $0x120] sm:$0xff] }
  0x5e   :  { %564 = vmatprep.mubr.bf16.mxu0 %v3142_v0  ;;  %607 = vmatprep.mubr.bf16.mxu1 %v3142_v0 }
  0x5f   :  { %2993 = vset.pattern.permute.xlu1 %v3146_v14  ;;  %2994 = vset.pattern.permute.xlu0 %v3147_v21  ;;  %v773_v14 = vld [vmem:[#allocation7 + $0x728] sm:$0xff] }
  0x60   :  { %535 = vmatpush1.bf16.msra.mxu0 %v2704_v24  ;;  %578 = vmatpush1.bf16.msra.mxu1 %v2706_v26  ;;  %v2756_v24 = vcombine.low %v716_v9, %v720_v10  ;;  %v2758_v26 = vcombine.low %v717_v11, %v721_v12  ;;  %v2805_v9 = vcombine.high %v764_v1, %v768_v2  ;;  %v772_v11 = vld [vmem:[#allocation7 + $0x720] sm:$0xff] }
  0x61   :  { %536 = vmatprep.subr.bf16.mxu0 %v2713_v27  ;;  %579 = vmatprep.subr.bf16.mxu1 %v2715_v28  ;;  %v2765_v27 = vcombine.high %v724_v19, %v728_v20  ;;  %v2767_v28 = vcombine.high %v725_v22, %v729_v23  ;;  %v776_v12 = vld [vmem:[#allocation7 + $0x7a0] sm:$0xff] }
  0x62   :  { %669 = vperm.xlu1 %2993, %v3252_v25   ;;  %681 = vperm.xlu0 %2994, %v3252_v25  }
  0x64   :  { %537 = vmatpush1.bf16.msra.mxu0 %v2712_v33  ;;  %580 = vmatpush1.bf16.msra.mxu1 %v2714_v35  ;;  %v3148_v33 = vmov 6   ;;  %v2764_v35 = vcombine.low %v724_v19, %v728_v20  ;;  %v718_v20 = vld [vmem:[#allocation7 + $0x30] sm:$0xff] }
  0x65   :  { %538 = vmatprep.subr.bf16.mxu0 %v2721_v36  ;;  %581 = vmatprep.subr.bf16.mxu1 %v2723_v37  ;;  %v2766_v36 = vcombine.low %v725_v22, %v729_v23  ;;  %v2773_v37 = vcombine.high %v732_v29, %v736_v30  ;;  %v3152_v22 = vmov 11   ;;  %v719_v23 = vld [vmem:[#allocation7 + $0x38] sm:$0xff] }
  0x66   :  { %673 = vperm.xlu1 %2993, %v3258_v34   ;;  %2997 = vset.pattern.permute.xlu0 %v3148_v33 }
  0x67   :  { %697 = vperm.xlu0 %2997, %v3258_v34  }
  0x68   :  { %539 = vmatpush1.bf16.msra.mxu0 %v2720_v42  ;;  %582 = vmatpush1.bf16.msra.mxu1 %v2722_v43  ;;  %v745_v42 = vld [vmem:[#allocation7 + $0x3a8] sm:$0xff]  ;;  %v2772_v43 = vcombine.low %v732_v29, %v736_v30  ;;  %v726_v30 = vld [vmem:[#allocation7 + $0x130] sm:$0xff] }
  0x69   :  { %540 = vmatprep.subr.bf16.mxu0 %v2729_v44  ;;  %583 = vmatprep.subr.bf16.mxu1 %v2731_v45  ;;  %v2774_v44 = vcombine.low %v733_v31, %v737_v32  ;;  %v2781_v45 = vcombine.high %v740_v39, %v744_v40  ;;  %v2783_v46 = vcombine.high %v741_v41, %v745_v42  ;;  %v730_v31 = vld [vmem:[#allocation7 + $0x1b0] sm:$0xff]  ;;  %v727_v32 = vld [vmem:[#allocation7 + $0x138] sm:$0xff] }
  0x6a   :  { %2995 = vset.pattern.permute.xlu1 %v3147_v21  ;;  %v722_v21 = vld [vmem:[#allocation7 + $0xb0] sm:$0xff] }
  0x6b   :  { %685 = vperm.xlu1 %2995, %v3258_v34  }
  0x6c   :  { %541 = vmatpush1.bf16.msra.mxu0 %v2728_v51  ;;  %584 = vmatpush1.bf16.msra.mxu1 %v2730_v52  ;;  %v2780_v51 = vcombine.low %v740_v39, %v744_v40  ;;  %v2782_v52 = vcombine.low %v741_v41, %v745_v42  ;;  %v734_v40 = vld [vmem:[#allocation7 + $0x230] sm:$0xff]  ;;  %v735_v42 = vld [vmem:[#allocation7 + $0x238] sm:$0xff] }
  0x6d   :  { %542 = vmatprep.subr.bf16.mxu0 %v2737_v53  ;;  %585 = vmatprep.subr.bf16.mxu1 %v2739_v54  ;;  %v2789_v53 = vcombine.high %v748_v47, %v752_v48  ;;  %v2791_v54 = vcombine.high %v749_v49, %v753_v50  ;;  %v738_v41 = vld [vmem:[#allocation7 + $0x2b0] sm:$0xff] }
  0x6f   :  { %2996 = vset.pattern.permute.xlu1 %v3148_v33  ;;  %v731_v33 = vld [vmem:[#allocation7 + $0x1b8] sm:$0xff] }
  0x70   :  { %543 = vmatpush1.bf16.msra.mxu0 %v2736_v59  ;;  %586 = vmatpush1.bf16.msra.mxu1 %v2738_v60  ;;  %v3149_v59 = vmov 8   ;;  %v2788_v60 = vcombine.low %v748_v47, %v752_v48  ;;  %v2771_v39 = vcombine.high %v727_v32, %v731_v33  ;;  %v742_v48 = vld [vmem:[#allocation7 + $0x330] sm:$0xff] }
  0x71   :  { %544 = vmatprep.subr.bf16.mxu0 %v2745_v61  ;;  %587 = vmatprep.subr.bf16.mxu1 %v2747_v62  ;;  %v2790_v61 = vcombine.low %v749_v49, %v753_v50  ;;  %v2797_v62 = vcombine.high %v756_v55, %v760_v56  ;;  %v746_v49 = vld [vmem:[#allocation7 + $0x3b0] sm:$0xff]  ;;  %v743_v50 = vld [vmem:[#allocation7 + $0x338] sm:$0xff] }
  0x72   :  { %693 = vperm.xlu1 %2996, %v3252_v25   ;;  %2999 = vset.pattern.permute.xlu0 %v3149_v59 }
  0x73   :  { %1273 = vperm.xlu0 %2999, %v3252_v25  }
  0x74   :  { %545 = vmatpush1.bf16.msra.mxu0 %v2744_v5  ;;  %588 = vmatpush1.bf16.msra.mxu1 %v2746_v6  ;;  %v769_v5 = vld [vmem:[#allocation7 + $0x6a8] sm:$0xff]  ;;  %v2796_v6 = vcombine.low %v756_v55, %v760_v56  ;;  %v2785_v55 = vcombine.high %v742_v48, %v746_v49 }
  0x75   :  { %546 = vmatprep.subr.bf16.mxu0 %v2753_v7  ;;  %589 = vmatprep.subr.bf16.mxu1 %v2755_v8  ;;  %v3151_v7 = vmov 9   ;;  %v2798_v8 = vcombine.low %v757_v57, %v761_v58  ;;  %v2807_v10 = vcombine.high %v765_v4, %v769_v5  ;;  %v750_v57 = vld [vmem:[#allocation7 + $0x430] sm:$0xff] }
  0x76   :  { %2998 = vset.pattern.permute.xlu1 %v3150_v3  ;;  %v754_v58 = vld [vmem:[#allocation7 + $0x4b0] sm:$0xff] }
  0x77   :  { %705 = vperm.xlu1 %2998, %v3252_v25   ;;  %3002 = vset.pattern.permute.xlu0 %v3151_v7  ;;  %v758_v3 = vld [vmem:[#allocation7 + $0x530] sm:$0xff] }
  0x78   :  { %547 = vmatpush1.bf16.msra.mxu0 %v2752_v15  ;;  %590 = vmatpush1.bf16.msra.mxu1 %v2754_v16  ;;  %v777_v15 = vld [vmem:[#allocation7 + $0x7a8] sm:$0xff]  ;;  %v2804_v16 = vcombine.low %v764_v1, %v768_v2  ;;  %v2793_v1 = vcombine.high %v750_v57, %v754_v58 }
  0x79   :  { %1100 = vmatprep.subr.bf16.mxu0 %v2757_v17  ;;  %1143 = vmatprep.subr.bf16.mxu1 %v2759_v18  ;;  %v2806_v17 = vcombine.low %v765_v4, %v769_v5  ;;  %v2813_v18 = vcombine.high %v772_v11, %v776_v12  ;;  %v2815_v19 = vcombine.high %v773_v14, %v777_v15  ;;  %v762_v4 = vld [vmem:[#allocation7 + $0x5b0] sm:$0xff]  ;;  %v759_v5 = vld [vmem:[#allocation7 + $0x538] sm:$0xff] }
  0x7a   :  { %1289 = vperm.xlu0 %3002, %v3258_v34  }
  0x7b   :  { %565 = vmatmul.mubr.bf16.vlgmr.msra.gmra.mrb[4].mxu0 %v3248_v13  ;;  %608 = vmatmul.mubr.bf16.vlgmr.msra.gmra.mrb[4].mxu1 %v3248_v13 }
  0x7c   :  { %1101 = vmatpush1.bf16.msra.mxu0 %v2756_v24  ;;  %1144 = vmatpush1.bf16.msra.mxu1 %v2758_v26  ;;  %v723_v24 = vld [vmem:[#allocation7 + $0xb8] sm:$0xff]  ;;  %v2812_v26 = vcombine.low %v772_v11, %v776_v12  ;;  %v766_v12 = vld [vmem:[#allocation7 + $0x630] sm:$0xff] }
  0x7d   :  { %1102 = vmatprep.subr.bf16.mxu0 %v2765_v27  ;;  %1145 = vmatprep.subr.bf16.mxu1 %v2767_v28  ;;  %v2814_v27 = vcombine.low %v773_v14, %v777_v15  ;;  %v2761_v28 = vcombine.high %v718_v20, %v722_v21  ;;  %v2763_v29 = vcombine.high %v719_v23, %v723_v24  ;;  %v770_v14 = vld [vmem:[#allocation7 + $0x6b0] sm:$0xff]  ;;  %v767_v15 = vld [vmem:[#allocation7 + $0x638] sm:$0xff] }
  0x7e   :  { %1132 = vmatprep.mubr.bf16.mxu0 %v3142_v0  ;;  %1175 = vmatprep.mubr.bf16.mxu1 %v3142_v0 }
  0x7f   :  { %709 = vperm.xlu1 %2998, %v3258_v34   ;;  %3004 = vset.pattern.permute.xlu0 %v3152_v22 }
  0x80   :  { %1103 = vmatpush1.bf16.msra.mxu0 %v2764_v35  ;;  %1146 = vmatpush1.bf16.msra.mxu1 %v2766_v36  ;;  %v3153_v35 = vmov 12   ;;  %v2760_v36 = vcombine.low %v718_v20, %v722_v21  ;;  %v774_v21 = vld [vmem:[#allocation7 + $0x730] sm:$0xff] }
  0x81   :  { %1104 = vmatprep.subr.bf16.mxu0 %v2773_v37  ;;  %1147 = vmatprep.subr.bf16.mxu1 %v2775_v38  ;;  %v2762_v37 = vcombine.low %v719_v23, %v723_v24  ;;  %v2769_v38 = vcombine.high %v726_v30, %v730_v31  ;;  %v775_v23 = vld [vmem:[#allocation7 + $0x738] sm:$0xff] }
  0x82   :  { %1309 = vperm.xlu0 %3004, %v3252_v25   ;;  %v779_v24 = vld [vmem:[#allocation7 + $0x7b8] sm:$0xff] }
  0x83   :  { %3000 = vset.pattern.permute.xlu1 %v3149_v59  ;;  %v3155_v59 = vmov 14  }
  0x84   :  { %1105 = vmatpush1.bf16.msra.mxu0 %v2772_v43  ;;  %1148 = vmatpush1.bf16.msra.mxu1 %v2774_v44  ;;  %v739_v43 = vld [vmem:[#allocation7 + $0x2b8] sm:$0xff]  ;;  %v2768_v44 = vcombine.low %v726_v30, %v730_v31  ;;  %v2819_v30 = vcombine.high %v775_v23, %v779_v24  ;;  %v1368_v31 = vld [vmem:[#allocation7 + $0x40] sm:$0xff] }
  0x85   :  { %1106 = vmatprep.subr.bf16.mxu0 %v2781_v45  ;;  %1149 = vmatprep.subr.bf16.mxu1 %v2783_v46  ;;  %v2770_v45 = vcombine.low %v727_v32, %v731_v33  ;;  %v2777_v46 = vcombine.high %v734_v40, %v738_v41  ;;  %v2779_v47 = vcombine.high %v735_v42, %v739_v43  ;;  %v1372_v32 = vld [vmem:[#allocation7 + $0xc0] sm:$0xff]  ;;  %v1369_v33 = vld [vmem:[#allocation7 + $0x48] sm:$0xff] }
  0x86   :  { %1277 = vperm.xlu1 %3000, %v3258_v34   ;;  %3007 = vset.pattern.permute.xlu0 %v3153_v35 }
  0x87   :  { %1325 = vperm.xlu0 %3007, %v3258_v34  }
  0x88   :  { %1107 = vmatpush1.bf16.msra.mxu0 %v2780_v51  ;;  %1150 = vmatpush1.bf16.msra.mxu1 %v2782_v52  ;;  %v747_v51 = vld [vmem:[#allocation7 + $0x3b8] sm:$0xff]  ;;  %v3154_v52 = vmov 10  }
  0x89   :  { %1108 = vmatprep.subr.bf16.mxu0 %v2789_v53  ;;  %1151 = vmatprep.subr.bf16.mxu1 %v2791_v54  ;;  %v2776_v53 = vcombine.low %v734_v40, %v738_v41  ;;  %v2778_v54 = vcombine.low %v735_v42, %v739_v43  ;;  %v2787_v56 = vcombine.high %v743_v50, %v747_v51  ;;  %v1376_v41 = vld [vmem:[#allocation7 + $0x140] sm:$0xff]  ;;  %v3159_v43 = vmov 18  }
  0x8a   :  { %3001 = vset.pattern.permute.xlu1 %v3151_v7  ;;  %v3156_v7 = vmov 15   ;;  %v1380_v42 = vld [vmem:[#allocation7 + $0x1c0] sm:$0xff] }
  0x8b   :  { %1285 = vperm.xlu1 %3001, %v3252_v25   ;;  %3009 = vset.pattern.permute.xlu0 %v3155_v59 }
  0x8c   :  { %1109 = vmatpush1.bf16.msra.mxu0 %v2788_v60  ;;  %1152 = vmatpush1.bf16.msra.mxu1 %v2790_v61  ;;  %v751_v60 = vld [vmem:[#allocation7 + $0x438] sm:$0xff] }
  0x8d   :  { %1110 = vmatprep.subr.bf16.mxu0 %v2797_v62  ;;  %1153 = vmatprep.subr.bf16.mxu1 %v2799_v63  ;;  %v755_v61 = vld [vmem:[#allocation7 + $0x4b8] sm:$0xff]  ;;  %v2784_v62 = vcombine.low %v742_v48, %v746_v49  ;;  %v2786_v63 = vcombine.low %v743_v50, %v747_v51  ;;  %v2829_v48 = vcombine.high %v1376_v41, %v1380_v42  ;;  %v1384_v50 = vld [vmem:[#allocation7 + $0x240] sm:$0xff] }
  0x8e   :  { %1345 = vperm.xlu0 %3009, %v3252_v25   ;;  %v2795_v2 = vcombine.high %v751_v60, %v755_v61  ;;  %v1388_v51 = vld [vmem:[#allocation7 + $0x2c0] sm:$0xff] }
  0x8f   :  { %3003 = vset.pattern.permute.xlu1 %v3154_v52  ;;  %v1385_v52 = vld [vmem:[#allocation7 + $0x248] sm:$0xff] }
  0x90   :  { %1111 = vmatpush1.bf16.msra.mxu0 %v2796_v6  ;;  %1154 = vmatpush1.bf16.msra.mxu1 %v2798_v8  ;;  %v763_v6 = vld [vmem:[#allocation7 + $0x5b8] sm:$0xff]  ;;  %v2792_v8 = vcombine.low %v750_v57, %v754_v58  ;;  %v1392_v58 = vld [vmem:[#allocation7 + $0x340] sm:$0xff] }
  0x91   :  { %1112 = vmatprep.subr.bf16.mxu0 %v2805_v9  ;;  %1155 = vmatprep.subr.bf16.mxu1 %v2807_v10  ;;  %v2794_v9 = vcombine.low %v751_v60, %v755_v61  ;;  %v2801_v10 = vcombine.high %v758_v3, %v762_v4  ;;  %v2803_v11 = vcombine.high %v759_v5, %v763_v6  ;;  %v1396_v60 = vld [vmem:[#allocation7 + $0x3c0] sm:$0xff]  ;;  %v1393_v61 = vld [vmem:[#allocation7 + $0x348] sm:$0xff] }
  0x92   :  { %1297 = vperm.xlu1 %3003, %v3252_v25   ;;  %3012 = vset.pattern.permute.xlu0 %v3156_v7 }
  0x93   :  { %1361 = vperm.xlu0 %3012, %v3258_v34  }
  0x94   :  { %1113 = vmatpush1.bf16.msra.mxu0 %v2804_v16  ;;  %1156 = vmatpush1.bf16.msra.mxu1 %v2806_v17  ;;  %v771_v16 = vld [vmem:[#allocation7 + $0x6b8] sm:$0xff]  ;;  %v2800_v17 = vcombine.low %v758_v3, %v762_v4  ;;  %v1400_v4 = vld [vmem:[#allocation7 + $0x440] sm:$0xff] }
  0x95   :  { %1114 = vmatprep.subr.bf16.mxu0 %v2813_v18  ;;  %1157 = vmatprep.subr.bf16.mxu1 %v2815_v19  ;;  %v2802_v18 = vcombine.low %v759_v5, %v763_v6  ;;  %v2809_v19 = vcombine.high %v766_v12, %v770_v14  ;;  %v2811_v20 = vcombine.high %v767_v15, %v771_v16  ;;  %v1404_v5 = vld [vmem:[#allocation7 + $0x4c0] sm:$0xff]  ;;  %v3160_v6 = vmov 20  }
  0x96   :  { %1301 = vperm.xlu1 %3003, %v3258_v34  }
  0x98   :  { %1115 = vmatpush1.bf16.msra.mxu0 %v2812_v26  ;;  %1158 = vmatpush1.bf16.msra.mxu1 %v2814_v27  ;;  %v3157_v26 = vmov 17   ;;  %v2808_v27 = vcombine.low %v766_v12, %v770_v14  ;;  %v1408_v14 = vld [vmem:[#allocation7 + $0x540] sm:$0xff] }
  0x99   :  { %1186 = vmatprep.subr.bf16.mxu0 %v2761_v28  ;;  %1229 = vmatprep.subr.bf16.mxu1 %v2763_v29  ;;  %v2810_v28 = vcombine.low %v767_v15, %v771_v16  ;;  %v1412_v15 = vld [vmem:[#allocation7 + $0x5c0] sm:$0xff]  ;;  %v1409_v16 = vld [vmem:[#allocation7 + $0x548] sm:$0xff] }
  0x9a   :  { %3005 = vset.pattern.permute.xlu1 %v3152_v22  ;;  %v778_v22 = vld [vmem:[#allocation7 + $0x7b0] sm:$0xff]  ;;  %3014 = vset.pattern.permute.xlu0 %v3157_v26 }
  0x9b   :  { %1133 = vmatmul.mubr.bf16.vlgmr.msra.gmra.mrb[8].mxu0 %v3248_v13  ;;  %1176 = vmatmul.mubr.bf16.vlgmr.msra.gmra.mrb[8].mxu1 %v3248_v13  ;;  %v2817_v29 = vcombine.high %v774_v21, %v778_v22 }
  0x9c   :  { %1187 = vmatpush1.bf16.msra.mxu0 %v2760_v36  ;;  %1230 = vmatpush1.bf16.msra.mxu1 %v2762_v37  ;;  %v3158_v36 = vmov 13   ;;  %v2816_v37 = vcombine.low %v774_v21, %v778_v22  ;;  %v1416_v22 = vld [vmem:[#allocation7 + $0x640] sm:$0xff] }
  0x9d   :  { %1188 = vmatprep.subr.bf16.mxu0 %v2769_v38  ;;  %1231 = vmatprep.subr.bf16.mxu1 %v2771_v39  ;;  %v2818_v38 = vcombine.low %v775_v23, %v779_v24  ;;  %v2821_v39 = vcombine.high %v1368_v31, %v1372_v32  ;;  %v1420_v23 = vld [vmem:[#allocation7 + $0x6c0] sm:$0xff]  ;;  %v3162_v24 = vmov 16  }
  0x9e   :  { %1218 = vmatprep.mubr.bf16.mxu0 %v3142_v0  ;;  %1261 = vmatprep.mubr.bf16.mxu1 %v3142_v0 }
  0x9f   :  { %1313 = vperm.xlu1 %3005, %v3258_v34   ;;  %1937 = vperm.xlu0 %3014, %v3252_v25  }
  0xa0   :  { %1189 = vmatpush1.bf16.msra.mxu0 %v2768_v44  ;;  %1232 = vmatpush1.bf16.msra.mxu1 %v2770_v45  ;;  %v1377_v44 = vld [vmem:[#allocation7 + $0x148] sm:$0xff] }
  0xa1   :  { %1190 = vmatprep.subr.bf16.mxu0 %v2777_v46  ;;  %1233 = vmatprep.subr.bf16.mxu1 %v2779_v47  ;;  %v1381_v45 = vld [vmem:[#allocation7 + $0x1c8] sm:$0xff]  ;;  %v2820_v46 = vcombine.low %v1368_v31, %v1372_v32  ;;  %v2869_v31 = vcombine.high %v1416_v22, %v1420_v23 }
  0xa2   :  { %v2831_v49 = vcombine.high %v1377_v44, %v1381_v45 }
  0xa3   :  { %3006 = vset.pattern.permute.xlu1 %v3153_v35  ;;  %v1373_v35 = vld [vmem:[#allocation7 + $0xc8] sm:$0xff]  ;;  %3017 = vset.pattern.permute.xlu0 %v3159_v43 }
  0xa4   :  { %1191 = vmatpush1.bf16.msra.mxu0 %v2776_v53  ;;  %1234 = vmatpush1.bf16.msra.mxu1 %v2778_v54  ;;  %v2823_v40 = vcombine.high %v1369_v33, %v1373_v35  ;;  %v2822_v47 = vcombine.low %v1369_v33, %v1373_v35  ;;  %v1389_v53 = vld [vmem:[#allocation7 + $0x2c8] sm:$0xff]  ;;  %v2828_v54 = vcombine.low %v1376_v41, %v1380_v42  ;;  %v1424_v33 = vld [vmem:[#allocation7 + $0x740] sm:$0xff]  ;;  %v1370_v42 = vld [vmem:[#allocation7 + $0x50] sm:$0xff] }
  0xa5   :  { %1192 = vmatprep.subr.bf16.mxu0 %v2785_v55  ;;  %1235 = vmatprep.subr.bf16.mxu1 %v2787_v56  ;;  %v2830_v55 = vcombine.low %v1377_v44, %v1381_v45  ;;  %v2837_v56 = vcombine.high %v1384_v50, %v1388_v51  ;;  %v2839_v57 = vcombine.high %v1385_v52, %v1389_v53  ;;  %v1428_v35 = vld [vmem:[#allocation7 + $0x7c0] sm:$0xff]  ;;  %v1374_v44 = vld [vmem:[#allocation7 + $0xd0] sm:$0xff]  ;;  %v1371_v45 = vld [vmem:[#allocation7 + $0x58] sm:$0xff] }
  0xa6   :  { %1321 = vperm.xlu1 %3006, %v3252_v25   ;;  %1953 = vperm.xlu0 %3017, %v3258_v34  }
  0xa8   :  { %1193 = vmatpush1.bf16.msra.mxu0 %v2784_v62  ;;  %1236 = vmatpush1.bf16.msra.mxu1 %v2786_v63  ;;  %v1397_v62 = vld [vmem:[#allocation7 + $0x3c8] sm:$0xff]  ;;  %v2836_v63 = vcombine.low %v1384_v50, %v1388_v51  ;;  %v1378_v51 = vld [vmem:[#allocation7 + $0x150] sm:$0xff] }
  0xa9   :  { %1194 = vmatprep.subr.bf16.mxu0 %v2793_v1  ;;  %1237 = vmatprep.subr.bf16.mxu1 %v2795_v2  ;;  %v2838_v1 = vcombine.low %v1385_v52, %v1389_v53  ;;  %v2845_v2 = vcombine.high %v1392_v58, %v1396_v60  ;;  %v2847_v3 = vcombine.high %v1393_v61, %v1397_v62  ;;  %v1382_v52 = vld [vmem:[#allocation7 + $0x1d0] sm:$0xff]  ;;  %v3163_v53 = vmov 23  }
  0xaa   :  { %3008 = vset.pattern.permute.xlu1 %v3158_v36  ;;  %3019 = vset.pattern.permute.xlu0 %v3160_v6  ;;  %v1425_v36 = vld [vmem:[#allocation7 + $0x748] sm:$0xff] }
  0xab   :  { %1333 = vperm.xlu1 %3008, %v3252_v25   ;;  %1973 = vperm.xlu0 %3019, %v3252_v25  }
  0xac   :  { %1195 = vmatpush1.bf16.msra.mxu0 %v2792_v8  ;;  %1238 = vmatpush1.bf16.msra.mxu1 %v2794_v9  ;;  %v1401_v8 = vld [vmem:[#allocation7 + $0x448] sm:$0xff] }
  0xad   :  { %1196 = vmatprep.subr.bf16.mxu0 %v2801_v10  ;;  %1239 = vmatprep.subr.bf16.mxu1 %v2803_v11  ;;  %v1405_v9 = vld [vmem:[#allocation7 + $0x4c8] sm:$0xff]  ;;  %v2846_v10 = vcombine.low %v1393_v61, %v1397_v62  ;;  %v2853_v11 = vcombine.high %v1400_v4, %v1404_v5  ;;  %v1390_v61 = vld [vmem:[#allocation7 + $0x2d0] sm:$0xff]  ;;  %v1387_v62 = vld [vmem:[#allocation7 + $0x258] sm:$0xff] }
  0xae   :  { %v2855_v12 = vcombine.high %v1401_v8, %v1405_v9 }
  0xaf   :  { %1337 = vperm.xlu1 %3008, %v3258_v34  }
  0xb0   :  { %1197 = vmatpush1.bf16.msra.mxu0 %v2800_v17  ;;  %1240 = vmatpush1.bf16.msra.mxu1 %v2802_v18  ;;  %v1413_v17 = vld [vmem:[#allocation7 + $0x5c8] sm:$0xff]  ;;  %v3161_v18 = vmov 21  }
  0xb1   :  { %1198 = vmatprep.subr.bf16.mxu0 %v2809_v19  ;;  %1241 = vmatprep.subr.bf16.mxu1 %v2811_v20  ;;  %v2852_v19 = vcombine.low %v1400_v4, %v1404_v5  ;;  %v2861_v20 = vcombine.high %v1408_v14, %v1412_v15  ;;  %v2863_v21 = vcombine.high %v1409_v16, %v1413_v17  ;;  %v1394_v5 = vld [vmem:[#allocation7 + $0x350] sm:$0xff] }
  0xb2   :  { %3022 = vset.pattern.permute.xlu0 %v3161_v18 }
  0xb3   :  { %3010 = vset.pattern.permute.xlu1 %v3155_v59  ;;  %v2844_v59 = vcombine.low %v1392_v58, %v1396_v60  ;;  %1989 = vperm.xlu0 %3022, %v3258_v34   ;;  %v1386_v60 = vld [vmem:[#allocation7 + $0x250] sm:$0xff] }
  0xb4   :  { %1199 = vmatpush1.bf16.msra.mxu0 %v2808_v27  ;;  %1242 = vmatpush1.bf16.msra.mxu1 %v2810_v28  ;;  %v1417_v27 = vld [vmem:[#allocation7 + $0x648] sm:$0xff] }
  0xb5   :  { %1200 = vmatprep.subr.bf16.mxu0 %v2817_v29  ;;  %1243 = vmatprep.subr.bf16.mxu1 %v2819_v30  ;;  %v1421_v28 = vld [vmem:[#allocation7 + $0x6c8] sm:$0xff]  ;;  %v2860_v29 = vcombine.low %v1408_v14, %v1412_v15  ;;  %v2862_v30 = vcombine.low %v1409_v16, %v1413_v17  ;;  %v1402_v16 = vld [vmem:[#allocation7 + $0x450] sm:$0xff] }
  0xb6   :  { %1349 = vperm.xlu1 %3010, %v3258_v34   ;;  %v2871_v32 = vcombine.high %v1417_v27, %v1421_v28  ;;  %v1406_v17 = vld [vmem:[#allocation7 + $0x4d0] sm:$0xff] }
  0xb7   :  { %3024 = vset.pattern.permute.xlu0 %v3163_v53 }
  0xb8   :  { %1201 = vmatpush1.bf16.msra.mxu0 %v2816_v37  ;;  %1244 = vmatpush1.bf16.msra.mxu1 %v2818_v38  ;;  %v1429_v37 = vld [vmem:[#allocation7 + $0x7c8] sm:$0xff]  ;;  %v2868_v38 = vcombine.low %v1416_v22, %v1420_v23  ;;  %v2857_v22 = vcombine.high %v1402_v16, %v1406_v17 }
  0xb9   :  { %1752 = vmatprep.subr.bf16.mxu0 %v2821_v39  ;;  %1795 = vmatprep.subr.bf16.mxu1 %v2823_v40  ;;  %v2870_v39 = vcombine.low %v1417_v27, %v1421_v28  ;;  %v2877_v40 = vcombine.high %v1424_v33, %v1428_v35  ;;  %v2879_v41 = vcombine.high %v1425_v36, %v1429_v37  ;;  %v1414_v27 = vld [vmem:[#allocation7 + $0x5d0] sm:$0xff]  ;;  %v3166_v28 = vmov 26  }
  0xba   :  { %3011 = vset.pattern.permute.xlu1 %v3156_v7  ;;  %v2854_v7 = vcombine.low %v1401_v8, %v1405_v9  ;;  %2009 = vperm.xlu0 %3024, %v3252_v25   ;;  %v1398_v8 = vld [vmem:[#allocation7 + $0x3d0] sm:$0xff]  ;;  %v1399_v9 = vld [vmem:[#allocation7 + $0x3d8] sm:$0xff] }
  0xbb   :  { %1219 = vmatmul.mubr.bf16.vlgmr.msra.gmra.mrb[12].mxu0 %v3248_v13  ;;  %1262 = vmatmul.mubr.bf16.vlgmr.msra.gmra.mrb[12].mxu1 %v3248_v13  ;;  %v2849_v14 = vcombine.high %v1394_v5, %v1398_v8 }
  0xbc   :  { %1753 = vmatpush1.bf16.msra.mxu0 %v2820_v46  ;;  %1796 = vmatpush1.bf16.msra.mxu1 %v2822_v47  ;;  %v1375_v46 = vld [vmem:[#allocation7 + $0xd8] sm:$0xff]  ;;  %v2876_v47 = vcombine.low %v1424_v33, %v1428_v35  ;;  %v1418_v35 = vld [vmem:[#allocation7 + $0x650] sm:$0xff] }
  0xbd   :  { %1754 = vmatprep.subr.bf16.mxu0 %v2829_v48  ;;  %1797 = vmatprep.subr.bf16.mxu1 %v2831_v49  ;;  %v2878_v48 = vcombine.low %v1425_v36, %v1429_v37  ;;  %v2825_v49 = vcombine.high %v1370_v42, %v1374_v44  ;;  %v2827_v50 = vcombine.high %v1371_v45, %v1375_v46  ;;  %v1422_v36 = vld [vmem:[#allocation7 + $0x6d0] sm:$0xff]  ;;  %v3339_v37 = vld [vmem:[#allocation5 + $0x8] sm:$0xff] }
  0xbe   :  { %1784 = vmatprep.mubr.bf16.mxu0 %v3142_v0  ;;  %1827 = vmatprep.mubr.bf16.mxu1 %v3142_v0 }
  0xbf   :  { %1357 = vperm.xlu1 %3011, %v3252_v25  }
  0xc0   :  { %1755 = vmatpush1.bf16.msra.mxu0 %v2828_v54  ;;  %1798 = vmatpush1.bf16.msra.mxu1 %v2830_v55  ;;  %v1379_v54 = vld [vmem:[#allocation7 + $0x158] sm:$0xff] }
  0xc1   :  { %1756 = vmatprep.subr.bf16.mxu0 %v2837_v56  ;;  %1799 = vmatprep.subr.bf16.mxu1 %v2839_v57  ;;  %v1383_v55 = vld [vmem:[#allocation7 + $0x1d8] sm:$0xff]  ;;  %v2826_v56 = vcombine.low %v1371_v45, %v1375_v46  ;;  %v2833_v57 = vcombine.high %v1378_v51, %v1382_v52  ;;  %v1430_v45 = vld [vmem:[#allocation7 + $0x7d0] sm:$0xff] }
  0xc2   :  { %v2835_v58 = vcombine.high %v1379_v54, %v1383_v55  ;;  %v1427_v46 = vld [vmem:[#allocation7 + $0x758] sm:$0xff] }
  0xc3   :  { %3013 = vset.pattern.permute.xlu1 %v3162_v24  ;;  %v1410_v24 = vld [vmem:[#allocation7 + $0x550] sm:$0xff] }
  0xc4   :  { %1757 = vmatpush1.bf16.msra.mxu0 %v2836_v63  ;;  %1800 = vmatpush1.bf16.msra.mxu1 %v2838_v1  ;;  %v1391_v63 = vld [vmem:[#allocation7 + $0x2d8] sm:$0xff]  ;;  %v3164_v1 = vmov 24  }
  0xc5   :  { %1758 = vmatprep.subr.bf16.mxu0 %v2845_v2  ;;  %1801 = vmatprep.subr.bf16.mxu1 %v2847_v3  ;;  %v2834_v2 = vcombine.low %v1379_v54, %v1383_v55  ;;  %v2841_v3 = vcombine.high %v1386_v60, %v1390_v61  ;;  %v2843_v4 = vcombine.high %v1387_v62, %v1391_v63  ;;  %v2024_v54 = vld [vmem:[#allocation7 + $0xe0] sm:$0xff]  ;;  %v2021_v55 = vld [vmem:[#allocation7 + $0x68] sm:$0xff] }
  0xc6   :  { %1925 = vperm.xlu1 %3013, %v3252_v25   ;;  %3027 = vset.pattern.permute.xlu0 %v3164_v1 }
  0xc7   :  { %2581 = vperm.xlu0 %3027, %v3258_v34  }
  0xc8   :  { %1759 = vmatpush1.bf16.msra.mxu0 %v2844_v59  ;;  %1802 = vmatpush1.bf16.msra.mxu1 %v2846_v10  ;;  %v3165_v59 = vmov 19   ;;  %v2840_v10 = vcombine.low %v1386_v60, %v1390_v61  ;;  %v2028_v61 = vld [vmem:[#allocation7 + $0x160] sm:$0xff] }
  0xc9   :  { %1760 = vmatprep.subr.bf16.mxu0 %v2853_v11  ;;  %1803 = vmatprep.subr.bf16.mxu1 %v2855_v12  ;;  %v3331_v11 = vld [vmem:[#allocation5] sm:$0xff]  ;;  %v2842_v12 = vcombine.low %v1387_v62, %v1391_v63  ;;  %v2032_v62 = vld [vmem:[#allocation7 + $0x1e0] sm:$0xff]  ;;  %v3168_v63 = vmov 27  }
  0xca   :  { %1929 = vperm.xlu1 %3013, %v3258_v34  }
  0xcb   :  { %3029 = vset.pattern.permute.xlu0 %v3166_v28 }
  0xcc   :  { %1761 = vmatpush1.bf16.msra.mxu0 %v2852_v19  ;;  %1804 = vmatpush1.bf16.msra.mxu1 %v2854_v7  ;;  %v1403_v19 = vld [vmem:[#allocation7 + $0x458] sm:$0xff] }
  0xcd   :  { %1762 = vmatprep.subr.bf16.mxu0 %v2861_v20  ;;  %1805 = vmatprep.subr.bf16.mxu1 %v2863_v21  ;;  %v1407_v7 = vld [vmem:[#allocation7 + $0x4d8] sm:$0xff]  ;;  %v2848_v20 = vcombine.low %v1394_v5, %v1398_v8  ;;  %v2893_v5 = vcombine.high %v2028_v61, %v2032_v62 }
  0xce   :  { %3015 = vset.pattern.permute.xlu1 %v3157_v26  ;;  %v2824_v26 = vcombine.low %v1370_v42, %v1374_v44  ;;  %v2859_v23 = vcombine.high %v1403_v19, %v1407_v7  ;;  %2601 = vperm.xlu0 %3029, %v3331_v11   ;;  %v1426_v44 = vld [vmem:[#allocation7 + $0x750] sm:$0xff] }
  0xcf   :  { %1941 = vperm.xlu1 %3015, %v3258_v34  }
  0xd0   :  { %1763 = vmatpush1.bf16.msra.mxu0 %v2860_v29  ;;  %1806 = vmatpush1.bf16.msra.mxu1 %v2862_v30  ;;  %v1411_v29 = vld [vmem:[#allocation7 + $0x558] sm:$0xff] }
  0xd1   :  { %1764 = vmatprep.subr.bf16.mxu0 %v2869_v31  ;;  %1807 = vmatprep.subr.bf16.mxu1 %v2871_v32  ;;  %v1415_v30 = vld [vmem:[#allocation7 + $0x5d8] sm:$0xff]  ;;  %v2856_v31 = vcombine.low %v1402_v16, %v1406_v17  ;;  %v2865_v32 = vcombine.high %v1410_v24, %v1414_v27 }
  0xd2   :  { %v2867_v33 = vcombine.high %v1411_v29, %v1415_v30  ;;  %3032 = vset.pattern.permute.xlu0 %v3168_v63 }
  0xd3   :  { %3016 = vset.pattern.permute.xlu1 %v3159_v43  ;;  %v2832_v43 = vcombine.low %v1378_v51, %v1382_v52  ;;  %v2020_v52 = vld [vmem:[#allocation7 + $0x60] sm:$0xff]  ;;  %2617 = vperm.xlu0 %3032, %v3339_v37  }
  0xd4   :  { %1765 = vmatpush1.bf16.msra.mxu0 %v2868_v38  ;;  %1808 = vmatpush1.bf16.msra.mxu1 %v2870_v39  ;;  %v1419_v38 = vld [vmem:[#allocation7 + $0x658] sm:$0xff] }
  0xd5   :  { %1766 = vmatprep.subr.bf16.mxu0 %v2877_v40  ;;  %1809 = vmatprep.subr.bf16.mxu1 %v2879_v41  ;;  %v1423_v39 = vld [vmem:[#allocation7 + $0x6d8] sm:$0xff]  ;;  %v2864_v40 = vcombine.low %v1410_v24, %v1414_v27  ;;  %v2866_v41 = vcombine.low %v1411_v29, %v1415_v30  ;;  %v2052_v29 = vld [vmem:[#allocation7 + $0x460] sm:$0xff] }
  0xd6   :  { %1949 = vperm.xlu1 %3016, %v3252_v25   ;;  %v1395_v25 = vld [vmem:[#allocation7 + $0x358] sm:$0xff]  ;;  %v2875_v42 = vcombine.high %v1419_v38, %v1423_v39  ;;  %v2056_v30 = vld [vmem:[#allocation7 + $0x4e0] sm:$0xff] }
  0xd7   :  { %v2851_v15 = vcombine.high %v1395_v25, %v1399_v9  ;;  %v2850_v21 = vcombine.low %v1395_v25, %v1399_v9  ;;  %v2036_v25 = vld [vmem:[#allocation7 + $0x260] sm:$0xff] }
  0xd8   :  { %1767 = vmatpush1.bf16.msra.mxu0 %v2876_v47  ;;  %1810 = vmatpush1.bf16.msra.mxu1 %v2878_v48  ;;  %v1431_v47 = vld [vmem:[#allocation7 + $0x7d8] sm:$0xff]  ;;  %v2872_v48 = vcombine.low %v1418_v35, %v1422_v36  ;;  %v2040_v9 = vld [vmem:[#allocation7 + $0x2e0] sm:$0xff] }
  0xd9   :  { %1838 = vmatprep.subr.bf16.mxu0 %v2825_v49  ;;  %1881 = vmatprep.subr.bf16.mxu1 %v2827_v50  ;;  %v2874_v49 = vcombine.low %v1419_v38, %v1423_v39  ;;  %v2881_v50 = vcombine.high %v1426_v44, %v1430_v45  ;;  %v2883_v51 = vcombine.high %v1427_v46, %v1431_v47  ;;  %v2064_v38 = vld [vmem:[#allocation7 + $0x5e0] sm:$0xff]  ;;  %v2061_v39 = vld [vmem:[#allocation7 + $0x568] sm:$0xff] }
  0xda   :  { %3018 = vset.pattern.permute.xlu1 %v3165_v59  ;;  %v2037_v59 = vld [vmem:[#allocation7 + $0x268] sm:$0xff]  ;;  %v2901_v16 = vcombine.high %v2036_v25, %v2040_v9 }
  0xdb   :  { %1785 = vmatmul.mubr.bf16.vlgmr.msra.gmra.mrb[16].mxu0 %v3248_v13  ;;  %1828 = vmatmul.mubr.bf16.vlgmr.msra.gmra.mrb[16].mxu1 %v3248_v13 }
  0xdc   :  { %1839 = vmatpush1.bf16.msra.mxu0 %v2824_v26  ;;  %1882 = vmatpush1.bf16.msra.mxu1 %v2826_v56  ;;  %v2025_v26 = vld [vmem:[#allocation7 + $0xe8] sm:$0xff]  ;;  %v3167_v56 = vmov 22  }
  0xdd   :  { %1840 = vmatprep.subr.bf16.mxu0 %v2833_v57  ;;  %1883 = vmatprep.subr.bf16.mxu1 %v2835_v58  ;;  %v2882_v57 = vcombine.low %v1427_v46, %v1431_v47  ;;  %v2885_v58 = vcombine.high %v2020_v52, %v2024_v54  ;;  %v2887_v60 = vcombine.high %v2021_v55, %v2025_v26  ;;  %v2072_v46 = vld [vmem:[#allocation7 + $0x6e0] sm:$0xff]  ;;  %v3171_v47 = vmov 25  }
  0xde   :  { %1870 = vmatprep.mubr.bf16.mxu0 %v3142_v0  ;;  %1913 = vmatprep.mubr.bf16.mxu1 %v3142_v0 }
  0xdf   :  { %1961 = vperm.xlu1 %3018, %v3331_v11  }
  0xe0   :  { %1841 = vmatpush1.bf16.msra.mxu0 %v2832_v43  ;;  %1884 = vmatpush1.bf16.msra.mxu1 %v2834_v2  ;;  %v2029_v43 = vld [vmem:[#allocation7 + $0x168] sm:$0xff] }
  0xe1   :  { %1842 = vmatprep.subr.bf16.mxu0 %v2841_v3  ;;  %1885 = vmatprep.subr.bf16.mxu1 %v2843_v4  ;;  %v2033_v2 = vld [vmem:[#allocation7 + $0x1e8] sm:$0xff]  ;;  %v2884_v3 = vcombine.low %v2020_v52, %v2024_v54  ;;  %v2886_v4 = vcombine.low %v2021_v55, %v2025_v26  ;;  %v2076_v26 = vld [vmem:[#allocation7 + $0x760] sm:$0xff] }
  0xe2   :  { %v2895_v8 = vcombine.high %v2029_v43, %v2033_v2 }
  0xe3   :  { %1965 = vperm.xlu1 %3018, %v3258_v34   ;;  %v2858_v34 = vcombine.low %v1403_v19, %v1407_v7  ;;  %v2044_v19 = vld [vmem:[#allocation7 + $0x360] sm:$0xff] }
  0xe4   :  { %1843 = vmatpush1.bf16.msra.mxu0 %v2840_v10  ;;  %1886 = vmatpush1.bf16.msra.mxu1 %v2842_v12  ;;  %v2041_v10 = vld [vmem:[#allocation7 + $0x2e8] sm:$0xff]  ;;  %v3169_v12 = vmov 29   ;;  %v2048_v7 = vld [vmem:[#allocation7 + $0x3e0] sm:$0xff] }
  0xe5   :  { %1844 = vmatprep.subr.bf16.mxu0 %v2849_v14  ;;  %1887 = vmatprep.subr.bf16.mxu1 %v2851_v15  ;;  %v2892_v14 = vcombine.low %v2028_v61, %v2032_v62  ;;  %v2894_v15 = vcombine.low %v2029_v43, %v2033_v2  ;;  %v2903_v17 = vcombine.high %v2037_v59, %v2041_v10  ;;  %v2022_v43 = vld [vmem:[#allocation7 + $0x70] sm:$0xff] }
  0xe6   :  { %3034 = vset.pattern.permute.xlu0 %v3169_v12  ;;  %v2909_v24 = vcombine.high %v2044_v19, %v2048_v7  ;;  %v2026_v2 = vld [vmem:[#allocation7 + $0xf0] sm:$0xff] }
  0xe7   :  { %3020 = vset.pattern.permute.xlu1 %v3160_v6  ;;  %v2873_v6 = vcombine.high %v1418_v35, %v1422_v36  ;;  %2637 = vperm.xlu0 %3034, %v3331_v11   ;;  %v2060_v36 = vld [vmem:[#allocation7 + $0x560] sm:$0xff] }
  0xe8   :  { %1845 = vmatpush1.bf16.msra.mxu0 %v2848_v20  ;;  %1888 = vmatpush1.bf16.msra.mxu1 %v2850_v21  ;;  %v2045_v20 = vld [vmem:[#allocation7 + $0x368] sm:$0xff] }
  0xe9   :  { %1846 = vmatprep.subr.bf16.mxu0 %v2857_v22  ;;  %1889 = vmatprep.subr.bf16.mxu1 %v2859_v23  ;;  %v2049_v21 = vld [vmem:[#allocation7 + $0x3e8] sm:$0xff]  ;;  %v2900_v22 = vcombine.low %v2036_v25, %v2040_v9  ;;  %v2902_v23 = vcombine.low %v2037_v59, %v2041_v10  ;;  %v2889_v25 = vcombine.high %v2022_v43, %v2026_v2  ;;  %v2030_v59 = vld [vmem:[#allocation7 + $0x170] sm:$0xff] }
  0xea   :  { %1977 = vperm.xlu1 %3020, %v3339_v37   ;;  %v2911_v27 = vcombine.high %v2045_v20, %v2049_v21  ;;  %v2034_v10 = vld [vmem:[#allocation7 + $0x1f0] sm:$0xff] }
  0xec   :  { %1847 = vmatpush1.bf16.msra.mxu0 %v2856_v31  ;;  %1890 = vmatpush1.bf16.msra.mxu1 %v2858_v34  ;;  %v2053_v31 = vld [vmem:[#allocation7 + $0x468] sm:$0xff] }
  0xed   :  { %1848 = vmatprep.subr.bf16.mxu0 %v2865_v32  ;;  %1891 = vmatprep.subr.bf16.mxu1 %v2867_v33  ;;  %v2057_v34 = vld [vmem:[#allocation7 + $0x4e8] sm:$0xff]  ;;  %v2908_v32 = vcombine.low %v2044_v19, %v2048_v7  ;;  %v2917_v33 = vcombine.high %v2052_v29, %v2056_v30  ;;  %v2897_v19 = vcombine.high %v2030_v59, %v2034_v10 }
  0xee   :  { %3021 = vset.pattern.permute.xlu1 %v3161_v18  ;;  %v2880_v18 = vcombine.low %v1426_v44, %v1430_v45  ;;  %v2919_v35 = vcombine.high %v2053_v31, %v2057_v34  ;;  %v2068_v45 = vld [vmem:[#allocation7 + $0x660] sm:$0xff] }
  0xef   :  { %1985 = vperm.xlu1 %3021, %v3331_v11   ;;  %v2933_v54 = vcombine.high %v2068_v45, %v2072_v46 }
  0xf0   :  { %1849 = vmatpush1.bf16.msra.mxu0 %v2864_v40  ;;  %1892 = vmatpush1.bf16.msra.mxu1 %v2866_v41  ;;  %v2065_v40 = vld [vmem:[#allocation7 + $0x5e8] sm:$0xff]  ;;  %v3170_v41 = vmov 30  }
  0xf1   :  { %1850 = vmatprep.subr.bf16.mxu0 %v2873_v6  ;;  %1893 = vmatprep.subr.bf16.mxu1 %v2875_v42  ;;  %v2916_v6 = vcombine.low %v2052_v29, %v2056_v30  ;;  %v2925_v42 = vcombine.high %v2060_v36, %v2064_v38  ;;  %v2927_v44 = vcombine.high %v2061_v39, %v2065_v40  ;;  %v2046_v30 = vld [vmem:[#allocation7 + $0x370] sm:$0xff] }
  0xf2   :  { %3037 = vset.pattern.permute.xlu0 %v3170_v41  ;;  %v2926_v52 = vcombine.low %v2061_v39, %v2065_v40 }
  0xf3   :  { %3023 = vset.pattern.permute.xlu1 %v3167_v56  ;;  %2653 = vperm.xlu0 %3037, %v3339_v37   ;;  %v2080_v56 = vld [vmem:[#allocation7 + $0x7e0] sm:$0xff] }
  0xf4   :  { %1851 = vmatpush1.bf16.msra.mxu0 %v2872_v48  ;;  %1997 = vperm.xlu1 %3023, %v3331_v11   ;;  %v2069_v48 = vld [vmem:[#allocation7 + $0x668] sm:$0xff]  ;;  %v2941_v61 = vcombine.high %v2076_v26, %v2080_v56 }
  0xf5   :  { %1894 = vmatpush1.bf16.msra.mxu1 %v2874_v49  ;;  %1852 = vmatprep.subr.bf16.mxu0 %v2881_v50  ;;  %v2073_v49 = vld [vmem:[#allocation7 + $0x6e8] sm:$0xff]  ;;  %v2924_v50 = vcombine.low %v2060_v36, %v2064_v38  ;;  %v621_v38 = vpop.permute.xlu0 %620 }
  0xf6   :  { %1895 = vmatprep.subr.bf16.mxu1 %v2883_v51  ;;  %v3172_v51 = vmov 31   ;;  %v2935_v55 = vcombine.high %v2069_v48, %v2073_v49 }
  0xf7   :  { %3039 = vset.pattern.permute.xlu0 %v3172_v51 }
  0xf8   :  { %1853 = vmatpush1.bf16.msra.mxu0 %v2880_v18  ;;  %2001 = vperm.xlu1 %3023, %v3339_v37   ;;  %v2077_v18 = vld [vmem:[#allocation7 + $0x768] sm:$0xff] }
  0xf9   :  { %1896 = vmatpush1.bf16.msra.mxu1 %v2882_v57  ;;  %2404 = vmatprep.subr.bf16.mxu0 %v2885_v58  ;;  %v2081_v57 = vld [vmem:[#allocation7 + $0x7e8] sm:$0xff]  ;;  %v2932_v58 = vcombine.low %v2068_v45, %v2072_v46 }
  0xfa   :  { %2447 = vmatprep.subr.bf16.mxu1 %v2887_v60  ;;  %v2934_v60 = vcombine.low %v2069_v48, %v2073_v49  ;;  %v2943_v62 = vcombine.high %v2077_v18, %v2081_v57  ;;  %v2062_v49 = vld [vmem:[#allocation7 + $0x570] sm:$0xff] }
  0xfb   :  { %1871 = vmatmul.mubr.bf16.vlgmr.msra.gmra.mrb[20].mxu0 %v3248_v13 }
  0xfc   :  { %1914 = vmatmul.mubr.bf16.vlgmr.msra.gmra.mrb[20].mxu1 %v3248_v13  ;;  %2405 = vmatpush1.bf16.msra.mxu0 %v2884_v3  ;;  %v2023_v3 = vld [vmem:[#allocation7 + $0x78] sm:$0xff] }
  0xfd   :  { %2448 = vmatpush1.bf16.msra.mxu1 %v2886_v4  ;;  %2406 = vmatprep.subr.bf16.mxu0 %v2893_v5  ;;  %v2027_v4 = vld [vmem:[#allocation7 + $0xf8] sm:$0xff]  ;;  %v2940_v5 = vcombine.low %v2076_v26, %v2080_v56 }
  0xfe   :  { %2449 = vmatprep.subr.bf16.mxu1 %v2895_v8  ;;  %2436 = vmatprep.mubr.bf16.mxu0 %v3142_v0  ;;  %v2942_v8 = vcombine.low %v2077_v18, %v2081_v57  ;;  %v2891_v9 = vcombine.high %v2023_v3, %v2027_v4 }
  0xff   :  { %2479 = vmatprep.mubr.bf16.mxu1 %v3142_v0  ;;  %3025 = vset.pattern.permute.xlu1 %v3163_v53  ;;  %v2910_v53 = vcombine.low %v2045_v20, %v2049_v21  ;;  %v2038_v20 = vld [vmem:[#allocation7 + $0x270] sm:$0xff] }
 0x100   :  { %2407 = vmatpush1.bf16.msra.mxu0 %v2892_v14  ;;  %2013 = vperm.xlu1 %3025, %v3339_v37   ;;  %v2031_v14 = vld [vmem:[#allocation7 + $0x178] sm:$0xff]  ;;  %v2042_v21 = vld [vmem:[#allocation7 + $0x2f0] sm:$0xff] }
 0x101   :  { %2450 = vmatpush1.bf16.msra.mxu1 %v2894_v15  ;;  %2408 = vmatprep.subr.bf16.mxu0 %v2901_v16  ;;  %v2035_v15 = vld [vmem:[#allocation7 + $0x1f8] sm:$0xff]  ;;  %v2888_v16 = vcombine.low %v2022_v43, %v2026_v2 }
 0x102   :  { %2451 = vmatprep.subr.bf16.mxu1 %v2903_v17  ;;  %v3365_v17 = vpop.permute.xlu1 %633  ;;  %v2899_v7 = vcombine.high %v2031_v14, %v2035_v15  ;;  %v2075_v43 = vld [vmem:[#allocation7 + $0x6f8] sm:$0xff] }
 0x104   :  { %2409 = vmatpush1.bf16.msra.mxu0 %v2900_v22  ;;  %3026 = vset.pattern.permute.xlu1 %v3164_v1  ;;  %v2918_v1 = vcombine.low %v2053_v31, %v2057_v34  ;;  %v2039_v22 = vld [vmem:[#allocation7 + $0x278] sm:$0xff]  ;;  %v2050_v31 = vld [vmem:[#allocation7 + $0x3f0] sm:$0xff] }
 0x105   :  { %2452 = vmatpush1.bf16.msra.mxu1 %v2902_v23  ;;  %2410 = vmatprep.subr.bf16.mxu0 %v2909_v24  ;;  %v2043_v23 = vld [vmem:[#allocation7 + $0x2f8] sm:$0xff]  ;;  %v2896_v24 = vcombine.low %v2030_v59, %v2034_v10  ;;  %v2913_v39 = vcombine.high %v2046_v30, %v2050_v31  ;;  %v2912_v45 = vcombine.low %v2046_v30, %v2050_v31 }
 0x106   :  { %2453 = vmatprep.subr.bf16.mxu1 %v2911_v27  ;;  %2577 = vperm.xlu1 %3026, %v3331_v11   ;;  %v2905_v27 = vcombine.high %v2038_v20, %v2042_v21  ;;  %v2907_v29 = vcombine.high %v2039_v22, %v2043_v23  ;;  %v3371_v34 = vpop.permute.xlu1 %637  ;;  %v2906_v36 = vcombine.low %v2039_v22, %v2043_v23 }
 0x108   :  { %2411 = vmatpush1.bf16.msra.mxu0 %v2908_v32  ;;  %v2047_v32 = vld [vmem:[#allocation7 + $0x378] sm:$0xff] }
 0x109   :  { %2454 = vmatpush1.bf16.msra.mxu1 %v2910_v53  ;;  %2412 = vmatprep.subr.bf16.mxu0 %v2917_v33  ;;  %v2051_v53 = vld [vmem:[#allocation7 + $0x3f8] sm:$0xff]  ;;  %v3173_v33 = vmov 28  }
 0x10a   :  { %2455 = vmatprep.subr.bf16.mxu1 %v2919_v35  ;;  %3028 = vset.pattern.permute.xlu1 %v3171_v47  ;;  %v2904_v35 = vcombine.low %v2038_v20, %v2042_v21  ;;  %v2915_v40 = vcombine.high %v2047_v32, %v2051_v53  ;;  %v2914_v46 = vcombine.low %v2047_v32, %v2051_v53 }
 0x10b   :  { %2589 = vperm.xlu1 %3028, %v3331_v11  }
 0x10c   :  { %2413 = vmatpush1.bf16.msra.mxu0 %v2916_v6  ;;  %v2054_v6 = vld [vmem:[#allocation7 + $0x470] sm:$0xff] }
 0x10d   :  { %2456 = vmatpush1.bf16.msra.mxu1 %v2918_v1  ;;  %2414 = vmatprep.subr.bf16.mxu0 %v2925_v42  ;;  %v2058_v1 = vld [vmem:[#allocation7 + $0x4f0] sm:$0xff]  ;;  %v2055_v42 = vld [vmem:[#allocation7 + $0x478] sm:$0xff] }
 0x10e   :  { %2457 = vmatprep.subr.bf16.mxu1 %v2927_v44  ;;  %v2059_v44 = vld [vmem:[#allocation7 + $0x4f8] sm:$0xff]  ;;  %v2921_v47 = vcombine.high %v2054_v6, %v2058_v1  ;;  %v2920_v26 = vcombine.low %v2054_v6, %v2058_v1 }
 0x10f   :  { %2593 = vperm.xlu1 %3028, %v3339_v37   ;;  %v2923_v48 = vcombine.high %v2055_v42, %v2059_v44  ;;  %v2922_v56 = vcombine.low %v2055_v42, %v2059_v44 }
 0x110   :  { %2415 = vmatpush1.bf16.msra.mxu0 %v2924_v50  ;;  %v2066_v50 = vld [vmem:[#allocation7 + $0x5f0] sm:$0xff] }
 0x111   :  { %2458 = vmatpush1.bf16.msra.mxu1 %v2926_v52  ;;  %2416 = vmatprep.subr.bf16.mxu0 %v2933_v54  ;;  %v626_v52 = vpop.permute.xlu0 %625  ;;  %v2063_v54 = vld [vmem:[#allocation7 + $0x578] sm:$0xff]  ;;  %v2929_v18 = vcombine.high %v2062_v49, %v2066_v50  ;;  %v2928_v2 = vcombine.low %v2062_v49, %v2066_v50 }
 0x112   :  { %2459 = vmatprep.subr.bf16.mxu1 %v2935_v55  ;;  %v2067_v55 = vld [vmem:[#allocation7 + $0x5f8] sm:$0xff] }
 0x113   :  { %3030 = vset.pattern.permute.xlu1 %v3166_v28  ;;  %v2890_v28 = vcombine.low %v2023_v3, %v2027_v4  ;;  %v2931_v57 = vcombine.high %v2063_v54, %v2067_v55  ;;  %v2930_v4 = vcombine.low %v2063_v54, %v2067_v55 }
 0x114   :  { %2417 = vmatpush1.bf16.msra.mxu0 %v2932_v58  ;;  %2605 = vperm.xlu1 %3030, %v3339_v37  }
 0x115   :  { %2460 = vmatpush1.bf16.msra.mxu1 %v2934_v60  ;;  %2418 = vmatprep.subr.bf16.mxu0 %v2941_v61  ;;  %v2070_v60 = vld [vmem:[#allocation7 + $0x670] sm:$0xff]  ;;  %v646_v3 = vpop.permute.xlu0 %645 }
 0x116   :  { %2461 = vmatprep.subr.bf16.mxu1 %v2943_v62  ;;  %v2074_v61 = vld [vmem:[#allocation7 + $0x6f0] sm:$0xff]  ;;  %v2071_v62 = vld [vmem:[#allocation7 + $0x678] sm:$0xff] }
 0x117   :  { %v2936_v22 = vcombine.low %v2070_v60, %v2074_v61  ;;  %v2938_v23 = vcombine.low %v2071_v62, %v2075_v43 }
 0x118   :  { %2419 = vmatpush1.bf16.msra.mxu0 %v2940_v5  ;;  %3031 = vset.pattern.permute.xlu1 %v3168_v63  ;;  %v2898_v63 = vcombine.low %v2031_v14, %v2035_v15 }
 0x119   :  { %2462 = vmatpush1.bf16.msra.mxu1 %v2942_v8  ;;  %2490 = vmatprep.subr.bf16.mxu0 %v2889_v25  ;;  %v2939_v8 = vcombine.high %v2071_v62, %v2075_v43  ;;  %v2078_v25 = vld [vmem:[#allocation7 + $0x770] sm:$0xff] }
 0x11a   :  { %2533 = vmatprep.subr.bf16.mxu1 %v2891_v9  ;;  %2613 = vperm.xlu1 %3031, %v3331_v11   ;;  %v2082_v9 = vld [vmem:[#allocation7 + $0x7f0] sm:$0xff] }
 0x11b   :  { %2437 = vmatmul.mubr.bf16.vlgmr.msra.gmra.mrb[24].mxu0 %v3248_v13 }
 0x11c   :  { %2480 = vmatmul.mubr.bf16.vlgmr.msra.gmra.mrb[24].mxu1 %v3248_v13  ;;  %2491 = vmatpush1.bf16.msra.mxu0 %v2888_v16  ;;  %v2079_v16 = vld [vmem:[#allocation7 + $0x778] sm:$0xff] }
 0x11d   :  { %2534 = vmatpush1.bf16.msra.mxu1 %v2890_v28  ;;  %2492 = vmatprep.subr.bf16.mxu0 %v2897_v19  ;;  %v2083_v28 = vld [vmem:[#allocation7 + $0x7f8] sm:$0xff] }
 0x11e   :  { %2535 = vmatprep.subr.bf16.mxu1 %v2899_v7  ;;  %2522 = vmatprep.mubr.bf16.mxu0 %v3142_v0 }
 0x11f   :  { %2565 = vmatprep.mubr.bf16.mxu1 %v3142_v0  ;;  %3033 = vset.pattern.permute.xlu1 %v3173_v33  ;;  %v3376_v0 = vpop.permute.xlu1 %649  ;;  %v662_v33 = vpop.permute.xlu0 %661 }
 0x120   :  { %2493 = vmatpush1.bf16.msra.mxu0 %v2896_v24  ;;  %2625 = vperm.xlu1 %3033, %v3331_v11  }
 0x121   :  { %2536 = vmatpush1.bf16.msra.mxu1 %v2898_v63  ;;  %2494 = vmatprep.subr.bf16.mxu0 %v2905_v27 }
 0x122   :  { %2537 = vmatprep.subr.bf16.mxu1 %v2907_v29  ;;  %v2945_v29 = vcombine.high %v2078_v25, %v2082_v9 }
 0x123   :  { %v658_v58 = vpop.permute.xlu1 %657 }
 0x124   :  { %2495 = vmatpush1.bf16.msra.mxu0 %v2904_v35  ;;  %2629 = vperm.xlu1 %3033, %v3339_v37  }
 0x125   :  { %2538 = vmatpush1.bf16.msra.mxu1 %v2906_v36  ;;  %2496 = vmatprep.subr.bf16.mxu0 %v2913_v39  ;;  %v2946_v39 = vcombine.low %v2079_v16, %v2083_v28 }
 0x126   :  { %2539 = vmatprep.subr.bf16.mxu1 %v2915_v40 }
 0x127   :  { %v670_v59 = vpop.permute.xlu1 %669 }
 0x128   :  { %2497 = vmatpush1.bf16.msra.mxu0 %v2912_v45  ;;  %3035 = vset.pattern.permute.xlu1 %v3169_v12  ;;  %v2937_v12 = vcombine.high %v2070_v60, %v2074_v61 }
 0x129   :  { %2540 = vmatpush1.bf16.msra.mxu1 %v2914_v46  ;;  %2498 = vmatprep.subr.bf16.mxu0 %v2921_v47 }
 0x12a   :  { %2541 = vmatprep.subr.bf16.mxu1 %v2923_v48  ;;  %2641 = vperm.xlu1 %3035, %v3339_v37  }
 0x12b   :  { %v674_v1 = vpop.permute.xlu1 %673 }
 0x12c   :  { %2499 = vmatpush1.bf16.msra.mxu0 %v2920_v26 }
 0x12d   :  { %2542 = vmatpush1.bf16.msra.mxu1 %v2922_v56  ;;  %2500 = vmatprep.subr.bf16.mxu0 %v2929_v18 }
 0x12e   :  { %v480_v5 = vpop.f32.mrb[0].mxu0  ;;  %2543 = vmatprep.subr.bf16.mxu1 %v2931_v57  ;;  %3036 = vset.pattern.permute.xlu1 %v3170_v41  ;;  %v523_v15 = vpop.f32.mrb[0].mxu1 }
 0x12f   :  { %v628_v10 = vmul.f32 %v621_v38, %v480_v5  ;;  %v482_v14 = vpop.f32.mrb[1].mxu0  ;;  %2649 = vperm.xlu1 %3036, %v3331_v11   ;;  %v652_v20 = vmul.f32 %v646_v3, %v523_v15  ;;  %v525_v21 = vpop.f32.mrb[1].mxu1  ;;  %v2944_v38 = vcombine.low %v2078_v25, %v2082_v9 }
 0x130   :  { %v640_v19 = vmul.f32 %v3365_v17, %v482_v14  ;;  %v484_v7 = vpop.f32.mrb[2].mxu0  ;;  %2501 = vmatpush1.bf16.msra.mxu0 %v2928_v2  ;;  %v527_v27 = vpop.f32.mrb[2].mxu1  ;;  %v664_v41 = vmul.f32 %v658_v58, %v525_v21  ;;  %v2947_v17 = vcombine.high %v2079_v16, %v2083_v28 }
 0x131   :  { %v629_v24 = vmul.f32 %v626_v52, %v484_v7  ;;  %2544 = vmatpush1.bf16.msra.mxu1 %v2930_v4  ;;  %v486_v63 = vpop.f32.mrb[3].mxu0  ;;  %2502 = vmatprep.subr.bf16.mxu0 %v2937_v12  ;;  %v653_v32 = vmul.f32 %v3376_v0, %v527_v27  ;;  %v529_v53 = vpop.f32.mrb[3].mxu1 }
 0x132   :  { %v642_v30 = vadd.f32 %v640_v19, %v628_v10  ;;  %v641_v31 = vmul.f32 %v3371_v34, %v486_v63  ;;  %2545 = vmatprep.subr.bf16.mxu1 %v2939_v8  ;;  %v665_v34 = vmul.f32 %v662_v33, %v529_v53 }
 0x133   :  { %3038 = vset.pattern.permute.xlu1 %v3172_v51  ;;  %v686_v51 = vpop.permute.xlu1 %685 }
 0x134   :  { %v654_v35 = vadd.f32 %v652_v20, %v642_v30  ;;  %v643_v36 = vadd.f32 %v641_v31, %v629_v24  ;;  %2503 = vmatpush1.bf16.msra.mxu0 %v2936_v22  ;;  %2661 = vperm.xlu1 %3038, %v3331_v11   ;;  %v682_v11 = vpop.permute.xlu0 %681 }
 0x135   :  { %2546 = vmatpush1.bf16.msra.mxu1 %v2938_v23  ;;  %2504 = vmatprep.subr.bf16.mxu0 %v2945_v29 }
 0x136   :  { %v655_v40 = vadd.f32 %v653_v32, %v643_v36  ;;  %v666_v6 = vadd.f32 %v664_v41, %v654_v35  ;;  %2547 = vmatprep.subr.bf16.mxu1 %v2947_v17 }
 0x137   :  { %v694_v44 = vpop.permute.xlu1 %693 }
 0x138   :  { %v667_v42 = vadd.f32 %v665_v34, %v655_v40  ;;  %2505 = vmatpush1.bf16.msra.mxu0 %v2944_v38  ;;  %2665 = vperm.xlu1 %3038, %v3339_v37   ;;  %v698_v0 = vpop.permute.xlu0 %697 }
 0x139   :  { %2548 = vmatpush1.bf16.msra.mxu1 %v2946_v39 }
 0x13b   :  { %2523 = vmatmul.mubr.bf16.vlgmr.msra.gmra.mrb[28].mxu0 %v3248_v13  ;;  %v706_v45 = vpop.permute.xlu1 %705 }
 0x13c   :  { %2566 = vmatmul.mubr.bf16.vlgmr.msra.gmra.mrb[28].mxu1 %v3248_v13 }
 0x13f   :  { %v710_v47 = vpop.permute.xlu1 %709 }
 0x143   :  { %v1278_v25 = vpop.permute.xlu1 %1277 }
 0x147   :  { %v1286_v9 = vpop.permute.xlu1 %1285 }
 0x14b   :  { %v1298_v10 = vpop.permute.xlu1 %1297 }
 0x14e   :  { %v566_v46 = vpop.f32.mrb[4].mxu0  ;;  %v609_v50 = vpop.f32.mrb[4].mxu1 }
 0x14f   :  { %v676_v48 = vmul.f32 %v670_v59, %v566_v46  ;;  %v568_v49 = vpop.f32.mrb[5].mxu0  ;;  %v611_v55 = vpop.f32.mrb[5].mxu1  ;;  %v700_v56 = vmul.f32 %v694_v44, %v609_v50 }
 0x150   :  { %v688_v52 = vmul.f32 %v682_v11, %v568_v49  ;;  %v570_v54 = vpop.f32.mrb[6].mxu0  ;;  %v613_v57 = vpop.f32.mrb[6].mxu1  ;;  %v712_v13 = vmul.f32 %v706_v45, %v611_v55 }
 0x151   :  { %v678_v26 = vadd.f32 %v676_v48, %v666_v6  ;;  %v677_v37 = vmul.f32 %v674_v1, %v570_v54  ;;  %v572_v18 = vpop.f32.mrb[7].mxu0  ;;  %v615_v60 = vpop.f32.mrb[7].mxu1  ;;  %v701_v43 = vmul.f32 %v698_v0, %v613_v57 }
 0x152   :  { %v689_v58 = vmul.f32 %v686_v51, %v572_v18  ;;  %v713_v2 = vmul.f32 %v710_v47, %v615_v60  ;;  %v1274_v59 = vpop.permute.xlu0 %1273  ;;  %v1302_v15 = vpop.permute.xlu1 %1301 }
 0x153   :  { %v690_v61 = vadd.f32 %v688_v52, %v678_v26  ;;  %v679_v62 = vadd.f32 %v677_v37, %v667_v42 }
 0x155   :  { %v702_v3 = vadd.f32 %v700_v56, %v690_v61  ;;  %v691_v4 = vadd.f32 %v689_v58, %v679_v62 }
 0x156   :  { %v1290_v14 = vpop.permute.xlu0 %1289  ;;  %v1314_v31 = vpop.permute.xlu1 %1313 }
 0x157   :  { %v714_v12 = vadd.f32 %v712_v13, %v702_v3  ;;  %v703_v5 = vadd.f32 %v701_v43, %v691_v4 }
 0x159   :  { %v715_v8 = vadd.f32 %v713_v2, %v703_v5 }
 0x15a   :  { %v1310_v28 = vpop.permute.xlu0 %1309  ;;  %v1322_v39 = vpop.permute.xlu1 %1321 }
 0x15e   :  { %v1334_v42 = vpop.permute.xlu1 %1333  ;;  %v1326_v44 = vpop.permute.xlu0 %1325 }
 0x162   :  { %v1338_v51 = vpop.permute.xlu1 %1337  ;;  %v1346_v45 = vpop.permute.xlu0 %1345 }
 0x166   :  { %v1350_v11 = vpop.permute.xlu1 %1349  ;;  %v1362_v43 = vpop.permute.xlu0 %1361 }
 0x16a   :  { %v1358_v46 = vpop.permute.xlu1 %1357 }
 0x16e   :  { %v1134_v16 = vpop.f32.mrb[8].mxu0  ;;  %v1177_v20 = vpop.f32.mrb[8].mxu1 }
 0x16f   :  { %v1280_v19 = vmul.f32 %v1274_v59, %v1134_v16  ;;  %v1136_v7 = vpop.f32.mrb[9].mxu0  ;;  %v1179_v23 = vpop.f32.mrb[9].mxu1  ;;  %v1304_v27 = vmul.f32 %v1298_v10, %v1177_v20 }
 0x170   :  { %v1292_v21 = vmul.f32 %v1286_v9, %v1136_v7  ;;  %v1138_v22 = vpop.f32.mrb[10].mxu0  ;;  %v1181_v29 = vpop.f32.mrb[10].mxu1  ;;  %v1316_v35 = vmul.f32 %v1310_v28, %v1179_v23 }
 0x171   :  { %v1282_v24 = vadd.f32 %v1280_v19, %v714_v12  ;;  %v1281_v63 = vmul.f32 %v1278_v25, %v1138_v22  ;;  %v1140_v41 = vpop.f32.mrb[11].mxu0  ;;  %v1183_v32 = vpop.f32.mrb[11].mxu1  ;;  %v1305_v33 = vmul.f32 %v1302_v15, %v1181_v29 }
 0x172   :  { %v1293_v30 = vmul.f32 %v1290_v14, %v1140_v41  ;;  %v1317_v34 = vmul.f32 %v1314_v31, %v1183_v32  ;;  %v1926_v4 = vpop.permute.xlu1 %1925  ;;  %v1938_v10 = vpop.permute.xlu0 %1937 }
 0x173   :  { %v1294_v53 = vadd.f32 %v1292_v21, %v1282_v24  ;;  %v1283_v17 = vadd.f32 %v1281_v63, %v715_v8 }
 0x175   :  { %v1306_v36 = vadd.f32 %v1304_v27, %v1294_v53  ;;  %v1295_v38 = vadd.f32 %v1293_v30, %v1283_v17 }
 0x176   :  { %v1930_v9 = vpop.permute.xlu1 %1929  ;;  %v1954_v15 = vpop.permute.xlu0 %1953 }
 0x177   :  { %v1307_v40 = vadd.f32 %v1305_v33, %v1295_v38  ;;  %v1318_v6 = vadd.f32 %v1316_v35, %v1306_v36 }
 0x179   :  { %v1319_v1 = vadd.f32 %v1317_v34, %v1307_v40 }
 0x17a   :  { %v1942_v59 = vpop.permute.xlu1 %1941 }
 0x17e   :  { %v1950_v14 = vpop.permute.xlu1 %1949 }
 0x182   :  { %v1962_v28 = vpop.permute.xlu1 %1961 }
 0x186   :  { %v1966_v35 = vpop.permute.xlu1 %1965 }
 0x18e   :  { %v1220_v0 = vpop.f32.mrb[12].mxu0  ;;  %v1263_v49 = vpop.f32.mrb[12].mxu1 }
 0x18f   :  { %v1328_v47 = vmul.f32 %v1322_v39, %v1220_v0  ;;  %v1222_v48 = vpop.f32.mrb[13].mxu0  ;;  %v1265_v54 = vpop.f32.mrb[13].mxu1  ;;  %v1352_v37 = vmul.f32 %v1346_v45, %v1263_v49 }
 0x190   :  { %v1340_v50 = vmul.f32 %v1334_v42, %v1222_v48  ;;  %v1224_v52 = vpop.f32.mrb[14].mxu0  ;;  %v1267_v18 = vpop.f32.mrb[14].mxu1  ;;  %v1364_v62 = vmul.f32 %v1358_v46, %v1265_v54 }
 0x191   :  { %v1330_v55 = vadd.f32 %v1328_v47, %v1318_v6  ;;  %v1329_v26 = vmul.f32 %v1326_v44, %v1224_v52  ;;  %v1226_v56 = vpop.f32.mrb[15].mxu0  ;;  %v1269_v58 = vpop.f32.mrb[15].mxu1  ;;  %v1353_v61 = vmul.f32 %v1350_v11, %v1267_v18 }
 0x192   :  { %v1341_v57 = vmul.f32 %v1338_v51, %v1226_v56  ;;  %v1365_v8 = vmul.f32 %v1362_v43, %v1269_v58  ;;  %v1974_v51 = vpop.permute.xlu0 %1973 }
 0x193   :  { %v1342_v13 = vadd.f32 %v1340_v50, %v1330_v55  ;;  %v1331_v60 = vadd.f32 %v1329_v26, %v1319_v1  ;;  %v1978_v1 = vpop.permute.xlu1 %1977 }
 0x195   :  { %v1354_v2 = vadd.f32 %v1352_v37, %v1342_v13  ;;  %v1343_v3 = vadd.f32 %v1341_v57, %v1331_v60 }
 0x196   :  { %v1990_v11 = vpop.permute.xlu0 %1989 }
 0x197   :  { %v1355_v12 = vadd.f32 %v1353_v61, %v1343_v3  ;;  %v1366_v5 = vadd.f32 %v1364_v62, %v1354_v2  ;;  %v1986_v42 = vpop.permute.xlu1 %1985 }
 0x199   :  { %v1367_v25 = vadd.f32 %v1365_v8, %v1355_v12 }
 0x19a   :  { %v2010_v46 = vpop.permute.xlu0 %2009 }
 0x19b   :  { %v1998_v44 = vpop.permute.xlu1 %1997 }
 0x19f   :  { %v2002_v45 = vpop.permute.xlu1 %2001 }
 0x1a3   :  { %v2014_v58 = vpop.permute.xlu1 %2013 }
 0x1ae   :  { %v1786_v16 = vpop.f32.mrb[16].mxu0  ;;  %v1829_v20 = vpop.f32.mrb[16].mxu1 }
 0x1af   :  { %v1932_v19 = vmul.f32 %v1926_v4, %v1786_v16  ;;  %v1788_v7 = vpop.f32.mrb[17].mxu0  ;;  %v1831_v23 = vpop.f32.mrb[17].mxu1  ;;  %v1956_v27 = vmul.f32 %v1950_v14, %v1829_v20 }
 0x1b0   :  { %v1944_v21 = vmul.f32 %v1938_v10, %v1788_v7  ;;  %v1790_v22 = vpop.f32.mrb[18].mxu0  ;;  %v1833_v29 = vpop.f32.mrb[18].mxu1  ;;  %v1968_v17 = vmul.f32 %v1962_v28, %v1831_v23 }
 0x1b1   :  { %v1934_v24 = vadd.f32 %v1932_v19, %v1366_v5  ;;  %v1933_v63 = vmul.f32 %v1930_v9, %v1790_v22  ;;  %v1792_v41 = vpop.f32.mrb[19].mxu0  ;;  %v1835_v31 = vpop.f32.mrb[19].mxu1  ;;  %v1957_v33 = vmul.f32 %v1954_v15, %v1833_v29 }
 0x1b2   :  { %v1945_v30 = vmul.f32 %v1942_v59, %v1792_v41  ;;  %v1969_v6 = vmul.f32 %v1966_v35, %v1835_v31  ;;  %v2578_v4 = vpop.permute.xlu1 %2577  ;;  %v2582_v10 = vpop.permute.xlu0 %2581 }
 0x1b3   :  { %v1946_v32 = vadd.f32 %v1944_v21, %v1934_v24  ;;  %v1935_v53 = vadd.f32 %v1933_v63, %v1367_v25 }
 0x1b5   :  { %v1958_v36 = vadd.f32 %v1956_v27, %v1946_v32  ;;  %v1947_v38 = vadd.f32 %v1945_v30, %v1935_v53 }
 0x1b6   :  { %v2590_v9 = vpop.permute.xlu1 %2589  ;;  %v2602_v15 = vpop.permute.xlu0 %2601 }
 0x1b7   :  { %v1970_v39 = vadd.f32 %v1968_v17, %v1958_v36  ;;  %v1959_v40 = vadd.f32 %v1957_v33, %v1947_v38 }
 0x1b9   :  { %v1971_v34 = vadd.f32 %v1969_v6, %v1959_v40 }
 0x1ba   :  { %v2594_v59 = vpop.permute.xlu1 %2593  ;;  %v2618_v35 = vpop.permute.xlu0 %2617 }
 0x1be   :  { %v2606_v14 = vpop.permute.xlu1 %2605 }
 0x1c2   :  { %v2614_v28 = vpop.permute.xlu1 %2613 }
 0x1ce   :  { %v1872_v0 = vpop.f32.mrb[20].mxu0 }
 0x1cf   :  { %v1980_v47 = vmul.f32 %v1974_v51, %v1872_v0  ;;  %v1874_v48 = vpop.f32.mrb[21].mxu0  ;;  %v1915_v49 = vpop.f32.mrb[20].mxu1 }
 0x1d0   :  { %v1992_v50 = vmul.f32 %v1986_v42, %v1874_v48  ;;  %v1876_v52 = vpop.f32.mrb[22].mxu0  ;;  %v1917_v54 = vpop.f32.mrb[21].mxu1  ;;  %v2004_v37 = vmul.f32 %v1998_v44, %v1915_v49 }
 0x1d1   :  { %v1982_v55 = vadd.f32 %v1980_v47, %v1970_v39  ;;  %v1981_v26 = vmul.f32 %v1978_v1, %v1876_v52  ;;  %v1878_v56 = vpop.f32.mrb[23].mxu0  ;;  %v1919_v18 = vpop.f32.mrb[22].mxu1  ;;  %v2016_v43 = vmul.f32 %v2010_v46, %v1917_v54 }
 0x1d2   :  { %v1993_v57 = vmul.f32 %v1990_v11, %v1878_v56  ;;  %v1921_v13 = vpop.f32.mrb[23].mxu1  ;;  %v2005_v62 = vmul.f32 %v2002_v45, %v1919_v18  ;;  %v2638_v11 = vpop.permute.xlu0 %2637 }
 0x1d3   :  { %v1994_v60 = vadd.f32 %v1992_v50, %v1982_v55  ;;  %v1983_v61 = vadd.f32 %v1981_v26, %v1971_v34  ;;  %v2017_v8 = vmul.f32 %v2014_v58, %v1921_v13  ;;  %v2626_v34 = vpop.permute.xlu1 %2625 }
 0x1d5   :  { %v2006_v2 = vadd.f32 %v2004_v37, %v1994_v60  ;;  %v1995_v3 = vadd.f32 %v1993_v57, %v1983_v61 }
 0x1d6   :  { %v2654_v18 = vpop.permute.xlu0 %2653 }
 0x1d7   :  { %v2007_v12 = vadd.f32 %v2005_v62, %v1995_v3  ;;  %v2018_v5 = vadd.f32 %v2016_v43, %v2006_v2  ;;  %v2630_v42 = vpop.permute.xlu1 %2629 }
 0x1d9   :  { %v2019_v25 = vadd.f32 %v2017_v8, %v2007_v12 }
 0x1db   :  { %v2642_v51 = vpop.permute.xlu1 %2641 }
 0x1df   :  { %v2650_v44 = vpop.permute.xlu1 %2649 }
 0x1e3   :  { %v2662_v45 = vpop.permute.xlu1 %2661 }
 0x1e7   :  { %v2666_v61 = vpop.permute.xlu1 %2665 }
 0x1ee   :  { %v2438_v16 = vpop.f32.mrb[24].mxu0 }
 0x1ef   :  { %v2584_v19 = vmul.f32 %v2578_v4, %v2438_v16  ;;  %v2440_v7 = vpop.f32.mrb[25].mxu0  ;;  %v2481_v20 = vpop.f32.mrb[24].mxu1 }
 0x1f0   :  { %v2596_v21 = vmul.f32 %v2590_v9, %v2440_v7  ;;  %v2442_v22 = vpop.f32.mrb[26].mxu0  ;;  %v2483_v23 = vpop.f32.mrb[25].mxu1  ;;  %v2608_v27 = vmul.f32 %v2602_v15, %v2481_v20 }
 0x1f1   :  { %v2586_v24 = vadd.f32 %v2584_v19, %v2018_v5  ;;  %v2585_v63 = vmul.f32 %v2582_v10, %v2442_v22  ;;  %v2444_v41 = vpop.f32.mrb[27].mxu0  ;;  %v2485_v29 = vpop.f32.mrb[26].mxu1  ;;  %v2620_v33 = vmul.f32 %v2614_v28, %v2483_v23 }
 0x1f2   :  { %v2597_v30 = vmul.f32 %v2594_v59, %v2444_v41  ;;  %v2487_v31 = vpop.f32.mrb[27].mxu1  ;;  %v2609_v17 = vmul.f32 %v2606_v14, %v2485_v29 }
 0x1f3   :  { %v2598_v32 = vadd.f32 %v2596_v21, %v2586_v24  ;;  %v2587_v53 = vadd.f32 %v2585_v63, %v2019_v25  ;;  %v2621_v6 = vmul.f32 %v2618_v35, %v2487_v31 }
 0x1f5   :  { %v2610_v36 = vadd.f32 %v2608_v27, %v2598_v32  ;;  %v2599_v38 = vadd.f32 %v2597_v30, %v2587_v53 }
 0x1f7   :  { %v2611_v39 = vadd.f32 %v2609_v17, %v2599_v38  ;;  %v2622_v40 = vadd.f32 %v2620_v33, %v2610_v36 }
 0x1f9   :  { %v2623_v1 = vadd.f32 %v2621_v6, %v2611_v39 }
 0x20e   :  { %v2524_v0 = vpop.f32.mrb[28].mxu0 }
 0x20f   :  { %v2632_v46 = vmul.f32 %v2626_v34, %v2524_v0  ;;  %v2567_v47 = vpop.f32.mrb[28].mxu1  ;;  %v2526_v48 = vpop.f32.mrb[29].mxu0 }
 0x210   :  { %v2644_v49 = vmul.f32 %v2638_v11, %v2526_v48  ;;  %v2528_v50 = vpop.f32.mrb[30].mxu0  ;;  %v2569_v52 = vpop.f32.mrb[29].mxu1  ;;  %v2656_v58 = vmul.f32 %v2650_v44, %v2567_v47 }
 0x211   :  { %v2634_v54 = vadd.f32 %v2632_v46, %v2622_v40  ;;  %v2633_v55 = vmul.f32 %v2630_v42, %v2528_v50  ;;  %v2530_v26 = vpop.f32.mrb[31].mxu0  ;;  %v2571_v37 = vpop.f32.mrb[30].mxu1  ;;  %v2668_v43 = vmul.f32 %v2662_v45, %v2569_v52 }
 0x212   :  { %v2645_v56 = vmul.f32 %v2642_v51, %v2530_v26  ;;  %v2573_v57 = vpop.f32.mrb[31].mxu1  ;;  %v2657_v3 = vmul.f32 %v2654_v18, %v2571_v37 }
 0x213   :  { %v2646_v13 = vadd.f32 %v2644_v49, %v2634_v54  ;;  %v2635_v60 = vadd.f32 %v2633_v55, %v2623_v1  ;;  %v2669_v5 = vmul.f32 %v2666_v61, %v2573_v57 }
 0x215   :  { %v2658_v62 = vadd.f32 %v2656_v58, %v2646_v13  ;;  %v2647_v2 = vadd.f32 %v2645_v56, %v2635_v60 }
 0x217   :  { %v2670_v4 = vadd.f32 %v2668_v43, %v2658_v62  ;;  %v2659_v12 = vadd.f32 %v2657_v3, %v2647_v2 }
 0x219   :  { %2672 = vst [vmem:[#allocation8] sm:$0xff] %v2670_v4  ;;  %v2671_v8 = vadd.f32 %v2669_v5, %v2659_v12 }
 0x21b   :  { %2673 = vst [vmem:[#allocation8 + $0x8] sm:$0xff] %v2671_v8 }
 0x21c   :  { %3119 = shalt.err (!%p3116_p0)
}
 0x21d   :  { %s3120_s28 = scalar_lea.hbm %s3409_s3, 256 }
 0x21e   :  { %p3121_p1 = scmp.ne.s32.totalorder %s3409_s3, %s3120_s28  ;;  %p3124_p2 = scmp.lt.u32.totalorder %s3120_s28, %s3409_s3 }
 0x220   :  { %p3126_p3 = pnand %p3124_p2, %p3121_p1 }
 0x222   :  { %3129 = shalt.err (!%p3126_p3)
}
 0x223   :  { %2685 = dma.vmem_to_hbm [thread:$0]  %s2680_s22, 256, %s3409_s3, [#allocation4], %s3138_s24, %s3138_s24, %s3139_s25  }
 0x224   :  { %3134 = dma.done.wait [#allocation4], 256  }
 0x225   :  { %3135 = vsyncadd [#allocation4], 4294967040 }
 0x226   :  { %2689 = vsyncpa [#allocation3], 1 }
 0x227   :  { %2690 = vsyncpa [#allocation6], 1 }
 0x228   :  { %2691 = vsyncpa [#allocation4], 1 }

</bundles_post_ra>
